<compile_context>
chip_gen: v7x
topology: tpu7x:2x2x1
jax: 0.10.0
libtpu: 0.0.40
codegen_flags: <defaults>
</compile_context>

<pallas_src>
import functools

import jax
import jax.numpy as jnp
from jax import lax
from jax.experimental import pallas as pl
from jax.experimental.pallas import tpu as pltpu

_EPS_GN = 1e-5                      # nn.GroupNorm default eps
_VMEM_LIMIT = 32 * 1024 * 1024      # fits v5e/v6e/v7x scoped budgets


def _round_up(x, m):
    return (x + m - 1) // m * m


def _pad2(x, r, c):
    if x.shape == (r, c):
        return x
    return jnp.pad(x, ((0, r - x.shape[0]), (0, c - x.shape[1])))


# ----------------------------------------------------------------------------
# Kernel 1: tiled matmul + bias (bf16 MXU inputs, f32 accumulation)
# ----------------------------------------------------------------------------
def _matmul_bias_kernel(a_ref, b_ref, bias_ref, o_ref, acc_ref):
    @pl.when(pl.program_id(2) == 0)
    def _():
        acc_ref[...] = jnp.zeros_like(acc_ref)

    acc_ref[...] += jnp.dot(a_ref[...], b_ref[...],
                            preferred_element_type=jnp.float32)

    @pl.when(pl.program_id(2) == pl.num_programs(2) - 1)
    def _():
        o_ref[...] = (acc_ref[...] + bias_ref[...]).astype(o_ref.dtype)


def matmul_bias(a, b, bias, out_dtype=jnp.float32, tm=256, tn=256, tk=512):
    """(M,K) @ (K,N) + bias[N]; operands cast to bf16, f32 accumulation."""
    M, K = a.shape
    K2, N = b.shape
    assert K == K2
    tm = min(tm, _round_up(M, 16))
    tn = min(tn, _round_up(N, 128))
    tk = min(tk, _round_up(K, 128))
    Mp, Kp, Np = _round_up(M, tm), _round_up(K, tk), _round_up(N, tn)

    a_p = _pad2(a.astype(jnp.bfloat16), Mp, Kp)
    b_p = _pad2(b.astype(jnp.bfloat16), Kp, Np)
    bias_p = _pad2(bias.reshape(1, N).astype(jnp.float32), 1, Np)

    out = pl.pallas_call(
        _matmul_bias_kernel,
        out_shape=jax.ShapeDtypeStruct((Mp, Np), out_dtype),
        grid=(Mp // tm, Np // tn, Kp // tk),
        in_specs=[pl.BlockSpec((tm, tk), lambda i, j, k: (i, k)),
                  pl.BlockSpec((tk, tn), lambda i, j, k: (k, j)),
                  pl.BlockSpec((1, tn), lambda i, j, k: (0, j))],
        out_specs=pl.BlockSpec((tm, tn), lambda i, j, k: (i, j)),
        scratch_shapes=[pltpu.VMEM((tm, tn), jnp.float32)],
        compiler_params=pltpu.CompilerParams(
            dimension_semantics=("parallel", "parallel", "arbitrary"),
            vmem_limit_bytes=_VMEM_LIMIT),
    )(a_p, b_p, bias_p)
    return out[:M, :N]


# ----------------------------------------------------------------------------
# Kernel 2: SRU (GroupNorm + gate + reconstruct) fused with CRU squeeze convs
# ----------------------------------------------------------------------------
def _sru_squeeze_kernel(x_ref, gamma_ref, beta_ref, wg_ref, pool_ref,
                        wsq1_ref, wsq2_ref, o_ref, *, eps):
    v = x_ref[0]                                            # (HW, C) f32
    # Per-group GroupNorm stats via a constant (C,C) group-average matrix:
    # keeps all reductions sublane/MXU friendly (no per-group Python loop,
    # no VMEM scratch round trip).
    s = jnp.sum(v, axis=0, keepdims=True)                   # (1, C)
    s2 = jnp.sum(v * v, axis=0, keepdims=True)              # (1, C)
    mean = jnp.dot(s, pool_ref[...], preferred_element_type=jnp.float32)
    mean_sq = jnp.dot(s2, pool_ref[...], preferred_element_type=jnp.float32)
    var = jnp.maximum(mean_sq - mean * mean, 0.0)
    gn = (v - mean) * lax.rsqrt(var + eps) * gamma_ref[...] + beta_ref[...]

    rew = jax.nn.sigmoid(gn * wg_ref[...])                  # w_gamma gate
    w1 = jnp.where(rew > 0.5, 1.0, rew)
    w2 = jnp.where(rew > 0.5, 0.0, rew)
    x1 = (w1 * v).astype(jnp.bfloat16)
    x2 = (w2 * v).astype(jnp.bfloat16)

    # reconstruct() half-swap folded into the (row-rolled) squeeze weights:
    #   squeeze(reconstruct(x1, x2)) = x1 @ Wsq + x2 @ roll_rows(Wsq, C/2)
    sq = (jnp.dot(x1, wsq1_ref[...], preferred_element_type=jnp.float32)
          + jnp.dot(x2, wsq2_ref[...], preferred_element_type=jnp.float32))
    o_ref[0] = sq.astype(o_ref.dtype)


def sru_squeeze(x3, gamma_row, beta_row, wg_row, pool, wsq, wsq_swap):
    B, HW, C = x3.shape
    Csq = wsq.shape[1]
    rowspec = pl.BlockSpec((1, C), lambda b: (0, 0))
    return pl.pallas_call(
        functools.partial(_sru_squeeze_kernel, eps=_EPS_GN),
        out_shape=jax.ShapeDtypeStruct((B, HW, Csq), jnp.bfloat16),
        grid=(B,),
        in_specs=[pl.BlockSpec((1, HW, C), lambda b: (b, 0, 0)),
                  rowspec, rowspec, rowspec,
                  pl.BlockSpec((C, C), lambda b: (0, 0)),
                  pl.BlockSpec((C, Csq), lambda b: (0, 0)),
                  pl.BlockSpec((C, Csq), lambda b: (0, 0))],
        out_specs=pl.BlockSpec((1, HW, Csq), lambda b: (b, 0, 0)),
        compiler_params=pltpu.CompilerParams(
            dimension_semantics=("parallel",),
            vmem_limit_bytes=_VMEM_LIMIT),
    )(x3, gamma_row, beta_row, wg_row, pool, wsq, wsq_swap)


# ----------------------------------------------------------------------------
# Kernel 3: CRU finalize — GAP -> channel softmax -> scale -> split + add
# ----------------------------------------------------------------------------
def _cru_finalize_kernel(v_ref, fold_ref, o_ref, *, inv_hw):
    v = v_ref[0]                                            # (HW, 2C) f32
    m = jnp.sum(v, axis=0, keepdims=True) * inv_hw          # adaptive avg pool
    m = m - jnp.max(m, axis=-1, keepdims=True)
    e = jnp.exp(m)
    s = e / jnp.sum(e, axis=-1, keepdims=True)              # channel softmax
    # split+add via (2C, C) fold matrix [I; I] (avoids unaligned lane slices)
    o_ref[0] = jnp.dot(v * s, fold_ref[...],
                       preferred_element_type=jnp.float32)


def cru_finalize(out2c3, fold):
    B, HW, C2 = out2c3.shape
    C = C2 // 2
    return pl.pallas_call(
        functools.partial(_cru_finalize_kernel, inv_hw=1.0 / HW),
        out_shape=jax.ShapeDtypeStruct((B, HW, C), jnp.float32),
        grid=(B,),
        in_specs=[pl.BlockSpec((1, HW, C2), lambda b: (b, 0, 0)),
                  pl.BlockSpec((C2, C), lambda b: (0, 0))],
        out_specs=pl.BlockSpec((1, HW, C), lambda b: (b, 0, 0)),
        compiler_params=pltpu.CompilerParams(
            dimension_semantics=("parallel",),
            vmem_limit_bytes=_VMEM_LIMIT),
    )(out2c3, fold)


# ----------------------------------------------------------------------------
# Weight composition (pure JAX, tiny): fuses GWC + PWC1 + PWC2 + passthrough
# into one (9*Csq, 2C) matrix so CRU's cat([Y1, Y2]) is a single matmul.
# ----------------------------------------------------------------------------
def _build_cru_matmul_weights(p, C):
    Csq = C // 2          # squeezed channels: [up_s (C/4) | low_s (C/4)]
    cup = C // 4
    c8 = C // 8           # per-group input channels of GWC (groups = 2)
    gwc_w = p['gwc_w']                         # (C, C//8, 3, 3)
    pwc1_w = p['pwc1_w'][:, :, 0, 0]           # (C, C//4)
    pwc2_w = p['pwc2_w'][:, :, 0, 0]           # (3C//4, C//4)

    blocks = []
    for ki in range(3):
        for kj in range(3):
            blk = jnp.zeros((Csq, 2 * C), jnp.float32)
            # GWC group 0: out cols [0, C/2), in rows [0, c8)
            blk = blk.at[0:c8, 0:C // 2].set(gwc_w[0:C // 2, :, ki, kj].T)
            # GWC group 1: out cols [C/2, C), in rows [c8, 2*c8)
            blk = blk.at[c8:2 * c8, C // 2:C].set(gwc_w[C // 2:C, :, ki, kj].T)
            if ki == 1 and kj == 1:            # center tap = original pixel
                # PWC1(up_s) added into Y1
                blk = blk.at[0:cup, 0:C].add(pwc1_w.T)
                # PWC2(low_s) -> first 3C/4 channels of Y2
                blk = blk.at[cup:Csq, C:C + 3 * C // 4].set(pwc2_w.T)
                # low_s passthrough -> last C/4 channels of Y2
                blk = blk.at[cup:Csq, C + 3 * C // 4:2 * C].set(
                    jnp.eye(cup, dtype=jnp.float32))
            blocks.append(blk)
    w_big = jnp.concatenate(blocks, axis=0)                      # (9*Csq, 2C)
    bias_big = jnp.concatenate([p['gwc_b'].astype(jnp.float32),
                                jnp.zeros((C,), jnp.float32)])   # (2C,)
    return w_big, bias_big


# ----------------------------------------------------------------------------
# ScConv forward
# ----------------------------------------------------------------------------
def scconv_forward(x_nchw, p, group_num=4):
    B, C, H, W = x_nchw.shape
    HW = H * W
    x_nhwc = jnp.transpose(x_nchw, (0, 2, 3, 1)).astype(jnp.float32)
    x3 = x_nhwc.reshape(B, HW, C)

    # ---- SRU constants ----
    gamma = p['gn_w'].astype(jnp.float32)
    beta = p['gn_b'].astype(jnp.float32)
    wg = (gamma / jnp.sum(gamma)).reshape(1, C)       # w_gamma = w / sum(w)
    cg = C // group_num
    gid = jnp.arange(C) // cg
    pool = (gid[:, None] == gid[None, :]).astype(jnp.float32) / float(cg * HW)

    # ---- CRU squeeze weights (block-diagonal) + half-swap-rolled copy ----
    Csq = C // 2
    cup = C // 4
    wsq = jnp.zeros((C, Csq), jnp.float32)
    wsq = wsq.at[:C // 2, :cup].set(p['sq1_w'][:, :, 0, 0].T)
    wsq = wsq.at[C // 2:, cup:].set(p['sq2_w'][:, :, 0, 0].T)
    wsq_swap = jnp.concatenate([wsq[C // 2:], wsq[:C // 2]], axis=0)

    # Kernel 1: SRU + squeeze  -> (B, HW, Csq) bf16
    sq = sru_squeeze(x3, gamma.reshape(1, C), beta.reshape(1, C), wg, pool,
                     wsq.astype(jnp.bfloat16), wsq_swap.astype(jnp.bfloat16))

    # 3x3 / 9-tap im2col on the squeezed tensor (bf16, zero padding). Only 9
    # taps of a C/2-channel tensor, so this stays in JAX; K is tiled in-kernel.
    sq_nhwc = sq.reshape(B, H, W, Csq)
    xp = jnp.pad(sq_nhwc, ((0, 0), (1, 1), (1, 1), (0, 0)))
    cols = [xp[:, i:i + H, j:j + W, :] for i in range(3) for j in range(3)]
    patches = jnp.concatenate(cols, axis=-1).reshape(B * HW, 9 * Csq)

    # Kernel 2: fused GWC + PWC1 + PWC2 + passthrough  -> out = cat([Y1, Y2])
    w_big, bias_big = _build_cru_matmul_weights(p, C)
    out2c = matmul_bias(patches, w_big, bias_big, out_dtype=jnp.float32)

    # Kernel 3: softmax(GAP) * out ; split + add
    fold = jnp.concatenate([jnp.eye(C, dtype=jnp.float32),
                            jnp.eye(C, dtype=jnp.float32)], axis=0)
    out = cru_finalize(out2c.reshape(B, HW, 2 * C), fold)

    return jnp.transpose(out.reshape(B, H, W, C), (0, 3, 1, 2))


# ----------------------------------------------------------------------------
# Pure-JAX reference (mirrors the PyTorch module, f32) for self-checking
# ----------------------------------------------------------------------------
def _scconv_reference(x_nchw, p, group_num=4, eps=_EPS_GN):
    B, C, H, W = x_nchw.shape
    x = x_nchw.astype(jnp.float32)
    # SRU (nn.GroupNorm)
    xg = x.reshape(B, group_num, (C // group_num) * H * W)
    mean = jnp.mean(xg, axis=2, keepdims=True)
    var = jnp.mean((xg - mean) ** 2, axis=2, keepdims=True)
    xn = ((xg - mean) / jnp.sqrt(var + eps)).reshape(B, C, H, W)
    gn_x = xn * p['gn_w'].reshape(1, C, 1, 1) + p['gn_b'].reshape(1, C, 1, 1)
    w_gamma = (p['gn_w'] / jnp.sum(p['gn_w'])).reshape(1, C, 1, 1)
    rew = jax.nn.sigmoid(gn_x * w_gamma)
    w1 = jnp.where(rew > 0.5, 1.0, rew)
    w2 = jnp.where(rew > 0.5, 0.0, rew)
    x1, x2 = w1 * x, w2 * x
    h = C // 2
    y = jnp.concatenate([x1[:, :h] + x2[:, h:], x1[:, h:] + x2[:, :h]], axis=1)
    # CRU
    def conv1x1(z, w):
        return jnp.einsum('bchw,oc->bohw', z, w[:, :, 0, 0])
    up_s = conv1x1(y[:, :h], p['sq1_w'])
    low_s = conv1x1(y[:, h:], p['sq2_w'])
    gwc = lax.conv_general_dilated(
        up_s, p['gwc_w'], window_strides=(1, 1), padding=((1, 1), (1, 1)),
        dimension_numbers=('NCHW', 'OIHW', 'NCHW'), feature_group_count=2)
    gwc = gwc + p['gwc_b'].reshape(1, C, 1, 1)
    Y1 = gwc + conv1x1(up_s, p['pwc1_w'])
    Y2 = jnp.concatenate([conv1x1(low_s, p['pwc2_w']), low_s], axis=1)
    out = jnp.concatenate([Y1, Y2], axis=1)
    s = jax.nn.softmax(jnp.mean(out, axis=(2, 3), keepdims=True), axis=1)
    out = out * s
    return out[:, :C] + out[:, C:]


# ----------------------------------------------------------------------------
# Deterministic synthetic parameters (PyTorch-layout shapes)
# ----------------------------------------------------------------------------
def init_params(key, C):
    cup = C // 4                              # up_channel // squeeze_radio
    ks = jax.random.split(key, 8)

    def w(k, shape, scale):
        return scale * jax.random.normal(k, shape, jnp.float32)

    return {
        'gn_w': 1.0 + 0.1 * jax.random.normal(ks[0], (C,), jnp.float32),
        'gn_b': 0.1 * jax.random.normal(ks[1], (C,), jnp.float32),
        'sq1_w': w(ks[2], (cup, C // 2, 1, 1), 0.3),
        'sq2_w': w(ks[3], (cup, C // 2, 1, 1), 0.3),
        'gwc_w': w(ks[4], (C, C // 8, 3, 3), 0.15),
        'gwc_b': w(ks[5], (C,), 0.1),
        'pwc1_w': w(ks[6], (C, cup, 1, 1), 0.3),
        'pwc2_w': w(ks[7], (C - cup, cup, 1, 1), 0.3),
    }


if __name__ == "__main__":
    key = jax.random.PRNGKey(0)
    kx, kp = jax.random.split(key)
    B, C, H, W = 2, 16, 16, 16          # C must be a multiple of 8 for ScConv
    x = jax.random.normal(kx, (B, C, H, W), jnp.float32)
    params = init_params(kp, C)

    fwd = jax.jit(functools.partial(scconv_forward, group_num=4))
    out = fwd(x, params)
    jax.block_until_ready(out)

    assert out.shape == (B, C, H, W)
    assert bool(jnp.all(jnp.isfinite(out)))

    # Self-check against a pure-JAX f32 reference (bf16 MXU path -> loose tol).
    ref = _scconv_reference(x, params, group_num=4)
    mae = float(jnp.mean(jnp.abs(out - ref)))
    assert mae < 1e-2, f"mean abs error vs reference too large: {mae}"

    print("KERNEL_OK")
</pallas_src>

<mosaic_0001>
module attributes {stable_mosaic.version = 11 : i64} {
  func.func @_sru_squeeze_kernel(%arg0: i32, %arg1: memref<1x256x16xf32, #tpu.memory_space<vmem>>, %arg2: memref<1x16xf32, #tpu.memory_space<vmem>>, %arg3: memref<1x16xf32, #tpu.memory_space<vmem>>, %arg4: memref<1x16xf32, #tpu.memory_space<vmem>>, %arg5: memref<16x16xf32, #tpu.memory_space<vmem>>, %arg6: memref<16x8xbf16, #tpu.memory_space<vmem>>, %arg7: memref<16x8xbf16, #tpu.memory_space<vmem>>, %arg8: memref<1x256x8xbf16, #tpu.memory_space<vmem>>) attributes {dimension_semantics = [#tpu.dimension_semantics<parallel>], iteration_bounds = array<i64: 2>, scalar_prefetch = 0 : i64, scratch_operands = 0 : i64, tpu.core_type = #tpu.core_type<tc>, window_params = [{transform_indices = @transform_0, window_bounds = array<i64: 1, 256, 16>}, {pipeline_mode = #tpu.pipeline_mode<synchronous>, transform_indices = @transform_1, window_bounds = array<i64: 1, 16>}, {pipeline_mode = #tpu.pipeline_mode<synchronous>, transform_indices = @transform_2, window_bounds = array<i64: 1, 16>}, {pipeline_mode = #tpu.pipeline_mode<synchronous>, transform_indices = @transform_3, window_bounds = array<i64: 1, 16>}, {pipeline_mode = #tpu.pipeline_mode<synchronous>, transform_indices = @transform_4, window_bounds = array<i64: 16, 16>}, {pipeline_mode = #tpu.pipeline_mode<synchronous>, transform_indices = @transform_5, window_bounds = array<i64: 16, 8>}, {pipeline_mode = #tpu.pipeline_mode<synchronous>, transform_indices = @transform_6, window_bounds = array<i64: 16, 8>}, {transform_indices = @transform_7, window_bounds = array<i64: 1, 256, 8>}]} {
    %c0 = arith.constant 0 : index
    %c0_0 = arith.constant 0 : index
    %c0_1 = arith.constant 0 : index
    %0 = vector.load %arg1[%c0, %c0_0, %c0_1] : memref<1x256x16xf32, #tpu.memory_space<vmem>>, vector<1x256x16xf32>
    %1 = vector.shape_cast %0 : vector<1x256x16xf32> to vector<256x16xf32>
    %cst = arith.constant dense<0.000000e+00> : vector<16xf32>
    %2 = vector.multi_reduction <add>, %1, %cst [0] : vector<256x16xf32> to vector<16xf32>
    %3 = vector.shape_cast %2 : vector<16xf32> to vector<1x16xf32>
    %4 = arith.mulf %1, %1 : vector<256x16xf32>
    %cst_2 = arith.constant dense<0.000000e+00> : vector<16xf32>
    %5 = vector.multi_reduction <add>, %4, %cst_2 [0] : vector<256x16xf32> to vector<16xf32>
    %6 = vector.shape_cast %5 : vector<16xf32> to vector<1x16xf32>
    %c0_3 = arith.constant 0 : index
    %c0_4 = arith.constant 0 : index
    %7 = vector.load %arg5[%c0_3, %c0_4] : memref<16x16xf32, #tpu.memory_space<vmem>>, vector<16x16xf32>
    %cst_5 = arith.constant dense<0.000000e+00> : vector<1x16xf32>
    %8 = tpu.matmul %3, %7, %cst_5 {dimension_numbers = #tpu.dot_dimension_numbers<[1], [0], [0], [1], [0, 0, 1, 1], [], []>} : vector<1x16xf32>, vector<16x16xf32>, vector<1x16xf32> -> vector<1x16xf32>
    %c0_6 = arith.constant 0 : index
    %c0_7 = arith.constant 0 : index
    %9 = vector.load %arg5[%c0_6, %c0_7] : memref<16x16xf32, #tpu.memory_space<vmem>>, vector<16x16xf32>
    %cst_8 = arith.constant dense<0.000000e+00> : vector<1x16xf32>
    %10 = tpu.matmul %6, %9, %cst_8 {dimension_numbers = #tpu.dot_dimension_numbers<[1], [0], [0], [1], [0, 0, 1, 1], [], []>} : vector<1x16xf32>, vector<16x16xf32>, vector<1x16xf32> -> vector<1x16xf32>
    %11 = arith.mulf %8, %8 : vector<1x16xf32>
    %12 = arith.subf %10, %11 : vector<1x16xf32>
    %cst_9 = arith.constant 0.000000e+00 : f32
    %13 = vector.broadcast %cst_9 : f32 to vector<1x16xf32>
    %14 = arith.maximumf %12, %13 : vector<1x16xf32>
    %15 = vector.broadcast %8 : vector<1x16xf32> to vector<256x16xf32>
    %16 = arith.subf %1, %15 : vector<256x16xf32>
    %cst_10 = arith.constant 9.99999974E-6 : f32
    %17 = vector.broadcast %cst_10 : f32 to vector<1x16xf32>
    %18 = arith.addf %14, %17 : vector<1x16xf32>
    %19 = math.rsqrt %18 : vector<1x16xf32>
    %20 = vector.broadcast %19 : vector<1x16xf32> to vector<256x16xf32>
    %21 = arith.mulf %16, %20 : vector<256x16xf32>
    %c0_11 = arith.constant 0 : index
    %c0_12 = arith.constant 0 : index
    %22 = vector.load %arg2[%c0_11, %c0_12] : memref<1x16xf32, #tpu.memory_space<vmem>>, vector<1x16xf32>
    %23 = vector.broadcast %22 : vector<1x16xf32> to vector<256x16xf32>
    %24 = arith.mulf %21, %23 : vector<256x16xf32>
    %c0_13 = arith.constant 0 : index
    %c0_14 = arith.constant 0 : index
    %25 = vector.load %arg3[%c0_13, %c0_14] : memref<1x16xf32, #tpu.memory_space<vmem>>, vector<1x16xf32>
    %26 = vector.broadcast %25 : vector<1x16xf32> to vector<256x16xf32>
    %27 = arith.addf %24, %26 : vector<256x16xf32>
    %c0_15 = arith.constant 0 : index
    %c0_16 = arith.constant 0 : index
    %28 = vector.load %arg4[%c0_15, %c0_16] : memref<1x16xf32, #tpu.memory_space<vmem>>, vector<1x16xf32>
    %29 = vector.broadcast %28 : vector<1x16xf32> to vector<256x16xf32>
    %30 = arith.mulf %27, %29 : vector<256x16xf32>
    %31 = arith.negf %30 : vector<256x16xf32>
    %32 = math.exp %31 : vector<256x16xf32>
    %cst_17 = arith.constant 1.000000e+00 : f32
    %33 = vector.broadcast %cst_17 : f32 to vector<256x16xf32>
    %34 = arith.addf %33, %32 : vector<256x16xf32>
    %35 = arith.divf %33, %34 : vector<256x16xf32>
    %cst_18 = arith.constant 5.000000e-01 : f32
    %36 = vector.broadcast %cst_18 : f32 to vector<256x16xf32>
    %37 = arith.cmpf ogt, %35, %36 : vector<256x16xf32>
    %cst_19 = arith.constant 1.000000e+00 : f32
    %38 = vector.broadcast %cst_19 : f32 to vector<256x16xf32>
    %39 = arith.select %37, %38, %35 : vector<256x16xi1>, vector<256x16xf32>
    %cst_20 = arith.constant 5.000000e-01 : f32
    %40 = vector.broadcast %cst_20 : f32 to vector<256x16xf32>
    %41 = arith.cmpf ogt, %35, %40 : vector<256x16xf32>
    %cst_21 = arith.constant 0.000000e+00 : f32
    %42 = vector.broadcast %cst_21 : f32 to vector<256x16xf32>
    %43 = arith.select %41, %42, %35 : vector<256x16xi1>, vector<256x16xf32>
    %44 = arith.mulf %39, %1 : vector<256x16xf32>
    %45 = arith.truncf %44 : vector<256x16xf32> to vector<256x16xbf16>
    %46 = arith.mulf %43, %1 : vector<256x16xf32>
    %47 = arith.truncf %46 : vector<256x16xf32> to vector<256x16xbf16>
    %c0_22 = arith.constant 0 : index
    %c0_23 = arith.constant 0 : index
    %48 = vector.load %arg6[%c0_22, %c0_23] : memref<16x8xbf16, #tpu.memory_space<vmem>>, vector<16x8xbf16>
    %cst_24 = arith.constant dense<0.000000e+00> : vector<256x8xf32>
    %49 = tpu.matmul %45, %48, %cst_24 {dimension_numbers = #tpu.dot_dimension_numbers<[1], [0], [0], [1], [0, 0, 1, 1], [], []>} : vector<256x16xbf16>, vector<16x8xbf16>, vector<256x8xf32> -> vector<256x8xf32>
    %c0_25 = arith.constant 0 : index
    %c0_26 = arith.constant 0 : index
    %50 = vector.load %arg7[%c0_25, %c0_26] : memref<16x8xbf16, #tpu.memory_space<vmem>>, vector<16x8xbf16>
    %cst_27 = arith.constant dense<0.000000e+00> : vector<256x8xf32>
    %51 = tpu.matmul %47, %50, %cst_27 {dimension_numbers = #tpu.dot_dimension_numbers<[1], [0], [0], [1], [0, 0, 1, 1], [], []>} : vector<256x16xbf16>, vector<16x8xbf16>, vector<256x8xf32> -> vector<256x8xf32>
    %52 = arith.addf %49, %51 : vector<256x8xf32>
    %53 = arith.truncf %52 : vector<256x8xf32> to vector<256x8xbf16>
    %c0_28 = arith.constant 0 : index
    %c0_29 = arith.constant 0 : index
    %c0_30 = arith.constant 0 : index
    %54 = vector.load %arg8[%c0_28, %c0_29, %c0_30] : memref<1x256x8xbf16, #tpu.memory_space<vmem>>, vector<1x256x8xbf16>
    %55 = vector.shape_cast %54 : vector<1x256x8xbf16> to vector<256x8xbf16>
    %56 = vector.shape_cast %53 : vector<256x8xbf16> to vector<1x256x8xbf16>
    tpu.vector_store %arg8[%c0_28, %c0_29, %c0_30], %56 {strides = array<i32>} : memref<1x256x8xbf16, #tpu.memory_space<vmem>>, vector<1x256x8xbf16>,
    return
  }
  func.func @transform_0(%arg0: i32) -> (i32, i32, i32) {
    %c0_i32 = arith.constant 0 : i32
    %c0_i32_0 = arith.constant 0 : i32
    %c0_i32_1 = arith.constant 0 : i32
    return %arg0, %c0_i32, %c0_i32_0 : i32, i32, i32
  }
  func.func @transform_1(%arg0: i32) -> (i32, i32) {
    %c0_i32 = arith.constant 0 : i32
    %c0_i32_0 = arith.constant 0 : i32
    %c0_i32_1 = arith.constant 0 : i32
    return %c0_i32, %c0_i32_0 : i32, i32
  }
  func.func @transform_2(%arg0: i32) -> (i32, i32) {
    %c0_i32 = arith.constant 0 : i32
    %c0_i32_0 = arith.constant 0 : i32
    %c0_i32_1 = arith.constant 0 : i32
    return %c0_i32, %c0_i32_0 : i32, i32
  }
  func.func @transform_3(%arg0: i32) -> (i32, i32) {
    %c0_i32 = arith.constant 0 : i32
    %c0_i32_0 = arith.constant 0 : i32
    %c0_i32_1 = arith.constant 0 : i32
    return %c0_i32, %c0_i32_0 : i32, i32
  }
  func.func @transform_4(%arg0: i32) -> (i32, i32) {
    %c0_i32 = arith.constant 0 : i32
    %c0_i32_0 = arith.constant 0 : i32
    %c0_i32_1 = arith.constant 0 : i32
    return %c0_i32, %c0_i32_0 : i32, i32
  }
  func.func @transform_5(%arg0: i32) -> (i32, i32) {
    %c0_i32 = arith.constant 0 : i32
    %c0_i32_0 = arith.constant 0 : i32
    %c0_i32_1 = arith.constant 0 : i32
    return %c0_i32, %c0_i32_0 : i32, i32
  }
  func.func @transform_6(%arg0: i32) -> (i32, i32) {
    %c0_i32 = arith.constant 0 : i32
    %c0_i32_0 = arith.constant 0 : i32
    %c0_i32_1 = arith.constant 0 : i32
    return %c0_i32, %c0_i32_0 : i32, i32
  }
  func.func @transform_7(%arg0: i32) -> (i32, i32, i32) {
    %c0_i32 = arith.constant 0 : i32
    %c0_i32_0 = arith.constant 0 : i32
    %c0_i32_1 = arith.constant 0 : i32
    return %arg0, %c0_i32, %c0_i32_0 : i32, i32, i32
  }
}

module attributes {stable_mosaic.version = 11 : i64} {
  func.func @_matmul_bias_kernel(%arg0: i32, %arg1: i32, %arg2: i32, %arg3: memref<256x128xbf16, #tpu.memory_space<vmem>>, %arg4: memref<128x128xbf16, #tpu.memory_space<vmem>>, %arg5: memref<1x128xf32, #tpu.memory_space<vmem>>, %arg6: memref<256x128xf32, #tpu.memory_space<vmem>>, %arg7: memref<256x128xf32, #tpu.memory_space<vmem>>) attributes {dimension_semantics = [#tpu.dimension_semantics<parallel>, #tpu.dimension_semantics<parallel>, #tpu.dimension_semantics<arbitrary>], iteration_bounds = array<i64: 2, 1, 1>, scalar_prefetch = 0 : i64, scratch_operands = 1 : i64, tpu.core_type = #tpu.core_type<tc>, window_params = [{transform_indices = @transform_0, window_bounds = array<i64: 256, 128>}, {transform_indices = @transform_1, window_bounds = array<i64: 128, 128>}, {transform_indices = @transform_2, window_bounds = array<i64: 1, 128>}, {transform_indices = @transform_3, window_bounds = array<i64: 256, 128>}]} {
    %c0_i32 = arith.constant 0 : i32
    %0 = arith.cmpi eq, %arg2, %c0_i32 : i32
    %1 = arith.extui %0 : i1 to i32
    %c0_i32_0 = arith.constant 0 : i32
    %2 = arith.cmpi ne, %1, %c0_i32_0 : i32
    scf.if %2 {
      %cst_10 = arith.constant 0.000000e+00 : f32
      %12 = vector.broadcast %cst_10 : f32 to vector<256x128xf32>
      %c0_11 = arith.constant 0 : index
      %c0_12 = arith.constant 0 : index
      %13 = vector.load %arg7[%c0_11, %c0_12] : memref<256x128xf32, #tpu.memory_space<vmem>>, vector<256x128xf32>
      tpu.vector_store %arg7[%c0_11, %c0_12], %12 {strides = array<i32>} : memref<256x128xf32, #tpu.memory_space<vmem>>, vector<256x128xf32>,
    } else {
    }
    %c0 = arith.constant 0 : index
    %c0_1 = arith.constant 0 : index
    %3 = vector.load %arg7[%c0, %c0_1] : memref<256x128xf32, #tpu.memory_space<vmem>>, vector<256x128xf32>
    %c0_2 = arith.constant 0 : index
    %c0_3 = arith.constant 0 : index
    %4 = vector.load %arg3[%c0_2, %c0_3] : memref<256x128xbf16, #tpu.memory_space<vmem>>, vector<256x128xbf16>
    %c0_4 = arith.constant 0 : index
    %c0_5 = arith.constant 0 : index
    %5 = vector.load %arg4[%c0_4, %c0_5] : memref<128x128xbf16, #tpu.memory_space<vmem>>, vector<128x128xbf16>
    %cst = arith.constant dense<0.000000e+00> : vector<256x128xf32>
    %6 = tpu.matmul %4, %5, %cst {dimension_numbers = #tpu.dot_dimension_numbers<[1], [0], [0], [1], [0, 0, 1, 1], [], []>} : vector<256x128xbf16>, vector<128x128xbf16>, vector<256x128xf32> -> vector<256x128xf32>
    %7 = arith.addf %3, %6 : vector<256x128xf32>
    %c0_6 = arith.constant 0 : index
    %c0_7 = arith.constant 0 : index
    %8 = vector.load %arg7[%c0_6, %c0_7] : memref<256x128xf32, #tpu.memory_space<vmem>>, vector<256x128xf32>
    tpu.vector_store %arg7[%c0_6, %c0_7], %7 {strides = array<i32>} : memref<256x128xf32, #tpu.memory_space<vmem>>, vector<256x128xf32>,
    %c0_i32_8 = arith.constant 0 : i32
    %9 = arith.cmpi eq, %arg2, %c0_i32_8 : i32
    %10 = arith.extui %9 : i1 to i32
    %c0_i32_9 = arith.constant 0 : i32
    %11 = arith.cmpi ne, %10, %c0_i32_9 : i32
    scf.if %11 {
      %c0_10 = arith.constant 0 : index
      %c0_11 = arith.constant 0 : index
      %12 = vector.load %arg7[%c0_10, %c0_11] : memref<256x128xf32, #tpu.memory_space<vmem>>, vector<256x128xf32>
      %c0_12 = arith.constant 0 : index
      %c0_13 = arith.constant 0 : index
      %13 = vector.load %arg5[%c0_12, %c0_13] : memref<1x128xf32, #tpu.memory_space<vmem>>, vector<1x128xf32>
      %14 = vector.broadcast %13 : vector<1x128xf32> to vector<256x128xf32>
      %15 = arith.addf %12, %14 : vector<256x128xf32>
      %c0_14 = arith.constant 0 : index
      %c0_15 = arith.constant 0 : index
      %16 = vector.load %arg6[%c0_14, %c0_15] : memref<256x128xf32, #tpu.memory_space<vmem>>, vector<256x128xf32>
      tpu.vector_store %arg6[%c0_14, %c0_15], %15 {strides = array<i32>} : memref<256x128xf32, #tpu.memory_space<vmem>>, vector<256x128xf32>,
    } else {
    }
    return
  }
  func.func @transform_0(%arg0: i32, %arg1: i32, %arg2: i32) -> (i32, i32) {
    %c0_i32 = arith.constant 0 : i32
    return %arg0, %arg2 : i32, i32
  }
  func.func @transform_1(%arg0: i32, %arg1: i32, %arg2: i32) -> (i32, i32) {
    %c0_i32 = arith.constant 0 : i32
    return %arg2, %arg1 : i32, i32
  }
  func.func @transform_2(%arg0: i32, %arg1: i32, %arg2: i32) -> (i32, i32) {
    %c0_i32 = arith.constant 0 : i32
    %c0_i32_0 = arith.constant 0 : i32
    return %c0_i32, %arg1 : i32, i32
  }
  func.func @transform_3(%arg0: i32, %arg1: i32, %arg2: i32) -> (i32, i32) {
    %c0_i32 = arith.constant 0 : i32
    return %arg0, %arg1 : i32, i32
  }
}

module attributes {stable_mosaic.version = 11 : i64} {
  func.func @_cru_finalize_kernel(%arg0: i32, %arg1: memref<1x256x32xf32, #tpu.memory_space<vmem>>, %arg2: memref<32x16xf32, #tpu.memory_space<vmem>>, %arg3: memref<1x256x16xf32, #tpu.memory_space<vmem>>) attributes {dimension_semantics = [#tpu.dimension_semantics<parallel>], iteration_bounds = array<i64: 2>, scalar_prefetch = 0 : i64, scratch_operands = 0 : i64, tpu.core_type = #tpu.core_type<tc>, window_params = [{transform_indices = @transform_0, window_bounds = array<i64: 1, 256, 32>}, {pipeline_mode = #tpu.pipeline_mode<synchronous>, transform_indices = @transform_1, window_bounds = array<i64: 32, 16>}, {transform_indices = @transform_2, window_bounds = array<i64: 1, 256, 16>}]} {
    %c0 = arith.constant 0 : index
    %c0_0 = arith.constant 0 : index
    %c0_1 = arith.constant 0 : index
    %0 = vector.load %arg1[%c0, %c0_0, %c0_1] : memref<1x256x32xf32, #tpu.memory_space<vmem>>, vector<1x256x32xf32>
    %1 = vector.shape_cast %0 : vector<1x256x32xf32> to vector<256x32xf32>
    %cst = arith.constant dense<0.000000e+00> : vector<32xf32>
    %2 = vector.multi_reduction <add>, %1, %cst [0] : vector<256x32xf32> to vector<32xf32>
    %3 = vector.shape_cast %2 : vector<32xf32> to vector<1x32xf32>
    %cst_2 = arith.constant 3.906250e-03 : f32
    %4 = vector.broadcast %cst_2 : f32 to vector<1x32xf32>
    %5 = arith.mulf %3, %4 : vector<1x32xf32>
    %cst_3 = arith.constant dense<0xFF800000> : vector<1xf32>
    %6 = vector.multi_reduction <maximumf>, %5, %cst_3 [1] : vector<1x32xf32> to vector<1xf32>
    %7 = vector.shape_cast %6 : vector<1xf32> to vector<1x1xf32>
    %8 = vector.broadcast %7 : vector<1x1xf32> to vector<1x32xf32>
    %9 = arith.subf %5, %8 : vector<1x32xf32>
    %10 = math.exp %9 : vector<1x32xf32>
    %cst_4 = arith.constant dense<0.000000e+00> : vector<1xf32>
    %11 = vector.multi_reduction <add>, %10, %cst_4 [1] : vector<1x32xf32> to vector<1xf32>
    %12 = vector.shape_cast %11 : vector<1xf32> to vector<1x1xf32>
    %13 = vector.broadcast %12 : vector<1x1xf32> to vector<1x32xf32>
    %14 = arith.divf %10, %13 : vector<1x32xf32>
    %15 = vector.broadcast %14 : vector<1x32xf32> to vector<256x32xf32>
    %16 = arith.mulf %1, %15 : vector<256x32xf32>
    %c0_5 = arith.constant 0 : index
    %c0_6 = arith.constant 0 : index
    %17 = vector.load %arg2[%c0_5, %c0_6] : memref<32x16xf32, #tpu.memory_space<vmem>>, vector<32x16xf32>
    %cst_7 = arith.constant dense<0.000000e+00> : vector<256x16xf32>
    %18 = tpu.matmul %16, %17, %cst_7 {dimension_numbers = #tpu.dot_dimension_numbers<[1], [0], [0], [1], [0, 0, 1, 1], [], []>} : vector<256x32xf32>, vector<32x16xf32>, vector<256x16xf32> -> vector<256x16xf32>
    %c0_8 = arith.constant 0 : index
    %c0_9 = arith.constant 0 : index
    %c0_10 = arith.constant 0 : index
    %19 = vector.load %arg3[%c0_8, %c0_9, %c0_10] : memref<1x256x16xf32, #tpu.memory_space<vmem>>, vector<1x256x16xf32>
    %20 = vector.shape_cast %19 : vector<1x256x16xf32> to vector<256x16xf32>
    %21 = vector.shape_cast %18 : vector<256x16xf32> to vector<1x256x16xf32>
    tpu.vector_store %arg3[%c0_8, %c0_9, %c0_10], %21 {strides = array<i32>} : memref<1x256x16xf32, #tpu.memory_space<vmem>>, vector<1x256x16xf32>,
    return
  }
  func.func @transform_0(%arg0: i32) -> (i32, i32, i32) {
    %c0_i32 = arith.constant 0 : i32
    %c0_i32_0 = arith.constant 0 : i32
    %c0_i32_1 = arith.constant 0 : i32
    return %arg0, %c0_i32, %c0_i32_0 : i32, i32, i32
  }
  func.func @transform_1(%arg0: i32) -> (i32, i32) {
    %c0_i32 = arith.constant 0 : i32
    %c0_i32_0 = arith.constant 0 : i32
    %c0_i32_1 = arith.constant 0 : i32
    return %c0_i32, %c0_i32_0 : i32, i32
  }
  func.func @transform_2(%arg0: i32) -> (i32, i32, i32) {
    %c0_i32 = arith.constant 0 : i32
    %c0_i32_0 = arith.constant 0 : i32
    %c0_i32_1 = arith.constant 0 : i32
    return %arg0, %c0_i32, %c0_i32_0 : i32, i32, i32
  }
}

</mosaic_0001>

<bundles_post_ra>
// kernel: scconv_forward.3
= control target key start
LH: loop header
LB: loop body
LE: loop exit
PB: predicated region body
PF: predicated region fallthrough
CT: control target
= control target key end

     0   :  { %s2383_s24 = smov 0   ;;  %s3139_s0 = inlined_call_operand.vmem [shape: f32[2,256,16], index: 0, kind: input, shape index: {}]   ;;  %s3140_s1 = inlined_call_operand.vmem [shape: f32[1,16], index: 1, kind: input, shape index: {}]   ;;  %s3141_s2 = inlined_call_operand.vmem [shape: f32[1,16], index: 2, kind: input, shape index: {}]   ;;  %s3142_s3 = inlined_call_operand.vmem [shape: f32[1,16], index: 3, kind: input, shape index: {}]   ;;  %s3143_s4 = inlined_call_operand.vmem [shape: f32[16,16], index: 4, kind: input, shape index: {}]   ;;  %s3144_s5 = inlined_call_operand.vmem [shape: bf16[16,8], index: 5, kind: input, shape index: {}]   ;;  %s3145_s6 = inlined_call_operand.vmem [shape: bf16[16,8], index: 6, kind: input, shape index: {}]   ;;  %s3146_s7 = inlined_call_operand.vmem [shape: bf16[2,256,8], index: 7, kind: output, shape index: {}]  }
   0x1 LB: > { %s1859_s25 = sadd.s32 4294967295, %s2338_s24   ;;  %p1863_p0 = scmp.ge.s32.totalorder %s2338_s24, 1  ;;  %s2338_s24 = sphi %s2383_s24, %s17_s24  }
   0x2   : > { %p237_p1 = scmp.lt.s32.totalorder %s2338_s24, 3 }
   0x4   : > { %p238_p2 = pnand %p1863_p0, %p237_p1 }
   0x5   : > { %v483_v0 = vld [vmem:[%s3143_s4] sm:$0xff] (!%p238_p2)  ;;  %v484_v1 = vld [vmem:[%s3143_s4 + $0x8] sm:$0xff] (!%p238_p2)  ;;  %p269_p3 = scmp.lt.s32.totalorder (!%p238_p2), %s1859_s25, 1  ;;  %v2340_v2 = vmov (!%p238_p2), 0.0|0.0   ;;  %vm2341_vm0 = vmmov (!%p238_p2), 0   ;;  %v2342_v4 = vmov (!%p238_p2), 0.0  }
   0x6   : > { %241 = sbr.rel (%p238_p2) target bundleno = 686 (0x2ae), region = 48  ;;  %2129 = vmatprep.subr.bf16.mxu0 (!%p238_p2), %v2340_v2  ;;  %v2130_v3 = vpack.c.bf16 (!%p238_p2), %v484_v1, %v483_v0  ;;  %2132 = vmatprep.subr.bf16.mxu1 (!%p238_p2), %v2340_v2  ;;  %vm312_vm1 = vcmask (!%p238_p2), 130048  }
   0x7   : > { %2051 = vmatprep.mubr.msk.f32.mxu0 (!%p238_p2), %vm2341_vm0, %v2342_v4  ;;  %2058 = vmatprep.mubr.msk.f32.mxu1 (!%p238_p2), %vm2341_vm0, %v2342_v4 }
   0x8   : > { %2131 = vmatpush3.bf16.msra.mxu0 (!%p238_p2), %v2130_v3  ;;  %2134 = vmatpush3.bf16.msra.mxu1 (!%p238_p2), %v2130_v3 }
   0xd   : > { %s3151_s25 = smov (!%p269_p3, %s1859_s25), 1 }
   0xe   : > { %s1973_s30 = sshll.u32 %s3151_s25, 8  ;;  %s1974_s21 = sshll.u32 %s3151_s25, 7 }
   0xf   : > { %s2403_s10 = scalar_lea.vmem %s3139_s0, %s1973_s30  ;;  %s3070_s26 = scalar_lea.vmem %s3146_s7, %s1974_s21 }
  0x10   : > { %v2406_v5 = vld [vmem:[%s2403_s10] sm:$0xff]  ;;  %v2409_v6 = vld [vmem:[%s2403_s10 + $0x8] sm:$0xff]  ;;  %v2412_v7 = vld [vmem:[%s2403_s10 + $0x10] sm:$0xff] }
  0x11   : > { %v2415_v8 = vld [vmem:[%s2403_s10 + $0x18] sm:$0xff]  ;;  %v313_v9 = vsel %vm312_vm1, %v2406_v5, 0.0  ;;  %v314_v10 = vsel %vm312_vm1, %v2409_v6, 0.0  ;;  %v316_v11 = vsel %vm312_vm1, %v2412_v7, 0.0  ;;  %v2424_v12 = vld [vmem:[%s2403_s10 + $0x20] sm:$0xff]  ;;  %v2429_v15 = vld [vmem:[%s2403_s10 + $0x28] sm:$0xff]  ;;  %v382_v34 = vmul.f32 %v2406_v5, %v2406_v5 }
  0x12   : > { %v315_v13 = vadd.f32 %v314_v10, %v313_v9  ;;  %v318_v14 = vsel %vm312_vm1, %v2415_v8, 0.0  ;;  %v320_v17 = vsel %vm312_vm1, %v2424_v12, 0.0  ;;  %v2434_v18 = vld [vmem:[%s2403_s10 + $0x30] sm:$0xff]  ;;  %v322_v20 = vsel %vm312_vm1, %v2429_v15, 0.0  ;;  %v2439_v21 = vld [vmem:[%s2403_s10 + $0x38] sm:$0xff]  ;;  %v2444_v24 = vld [vmem:[%s2403_s10 + $0x40] sm:$0xff] }
  0x13   : > { %v324_v23 = vsel %vm312_vm1, %v2434_v18, 0.0  ;;  %v326_v26 = vsel %vm312_vm1, %v2439_v21, 0.0  ;;  %v2449_v27 = vld [vmem:[%s2403_s10 + $0x48] sm:$0xff]  ;;  %v328_v29 = vsel %vm312_vm1, %v2444_v24, 0.0  ;;  %v2454_v30 = vld [vmem:[%s2403_s10 + $0x50] sm:$0xff]  ;;  %v2457_v32 = vld [vmem:[%s2403_s10 + $0x58] sm:$0xff]  ;;  %v383_v35 = vmul.f32 %v2409_v6, %v2409_v6 }
  0x14   : > { %v317_v16 = vadd.f32 %v316_v11, %v315_v13  ;;  %v330_v33 = vsel %vm312_vm1, %v2449_v27, 0.0  ;;  %v384_v36 = vmul.f32 %v2412_v7, %v2412_v7  ;;  %v332_v38 = vsel %vm312_vm1, %v2454_v30, 0.0  ;;  %v2472_v40 = vld [vmem:[%s2403_s10 + $0x60] sm:$0xff]  ;;  %v2482_v47 = vld [vmem:[%s2403_s10 + $0x68] sm:$0xff]  ;;  %v2490_v53 = vld [vmem:[%s2403_s10 + $0x70] sm:$0xff] }
  0x15   : > { %v385_v39 = vmul.f32 %v2415_v8, %v2415_v8  ;;  %v334_v42 = vsel %vm312_vm1, %v2457_v32, 0.0  ;;  %v386_v43 = vmul.f32 %v2424_v12, %v2424_v12  ;;  %v414_v44 = vsel %vm312_vm1, %v382_v34, 0.0  ;;  %v2498_v59 = vld [vmem:[%s2403_s10 + $0x78] sm:$0xff]  ;;  %v2506_v1 = vld [vmem:[%s2403_s10 + $0x80] sm:$0xff]  ;;  %v2514_v11 = vld [vmem:[%s2403_s10 + $0x88] sm:$0xff] }
  0x16   : > { %v319_v19 = vadd.f32 %v318_v14, %v317_v16  ;;  %v415_v45 = vsel %vm312_vm1, %v383_v35, 0.0  ;;  %v417_v46 = vsel %vm312_vm1, %v384_v36, 0.0  ;;  %v336_v50 = vsel %vm312_vm1, %v2472_v40, 0.0 }
  0x17   : > { %v416_v49 = vadd.f32 %v415_v45, %v414_v44  ;;  %v387_v51 = vmul.f32 %v2429_v15, %v2429_v15  ;;  %v419_v52 = vsel %vm312_vm1, %v385_v39, 0.0  ;;  %v338_v56 = vsel %vm312_vm1, %v2482_v47, 0.0  ;;  %v2546_v44 = vld [vmem:[%s2403_s10 + $0xa8] sm:$0xff] }
  0x18   : > { %v321_v22 = vadd.f32 %v320_v17, %v319_v19  ;;  %v388_v57 = vmul.f32 %v2434_v18, %v2434_v18  ;;  %v421_v58 = vsel %vm312_vm1, %v386_v43, 0.0  ;;  %v340_v62 = vsel %vm312_vm1, %v2490_v53, 0.0 }
  0x19   : > { %v418_v55 = vadd.f32 %v417_v46, %v416_v49  ;;  %v389_v63 = vmul.f32 %v2439_v21, %v2439_v21  ;;  %v423_v0 = vsel %vm312_vm1, %v387_v51, 0.0  ;;  %v342_v4 = vsel %vm312_vm1, %v2498_v59, 0.0  ;;  %v2554_v51 = vld [vmem:[%s2403_s10 + $0xb0] sm:$0xff] }
  0x1a   : > { %v323_v25 = vadd.f32 %v322_v20, %v321_v22  ;;  %v390_v9 = vmul.f32 %v2444_v24, %v2444_v24  ;;  %v425_v10 = vsel %vm312_vm1, %v388_v57, 0.0  ;;  %v344_v16 = vsel %vm312_vm1, %v2506_v1, 0.0  ;;  %v2522_v20 = vld [vmem:[%s2403_s10 + $0x90] sm:$0xff] }
  0x1b   : > { %v420_v61 = vadd.f32 %v419_v52, %v418_v55  ;;  %v391_v17 = vmul.f32 %v2449_v27, %v2449_v27  ;;  %v427_v19 = vsel %vm312_vm1, %v389_v63, 0.0  ;;  %v348_v34 = vsel %vm312_vm1, %v2522_v20, 0.0 }
  0x1c   : > { %v325_v28 = vadd.f32 %v324_v23, %v323_v25  ;;  %v346_v25 = vsel %vm312_vm1, %v2514_v11, 0.0  ;;  %v393_v35 = vmul.f32 %v2457_v32, %v2457_v32  ;;  %v395_v49 = vmul.f32 %v2482_v47, %v2482_v47 }
  0x1d   : > { %v422_v3 = vadd.f32 %v421_v58, %v420_v61  ;;  %v431_v36 = vsel %vm312_vm1, %v391_v17, 0.0  ;;  %v354_v55 = vsel %vm312_vm1, %v2546_v44, 0.0  ;;  %v2562_v58 = vld [vmem:[%s2403_s10 + $0xb8] sm:$0xff]  ;;  %v397_v63 = vmul.f32 %v2498_v59, %v2498_v59 }
  0x1e   : > { %v327_v31 = vadd.f32 %v326_v26, %v325_v28  ;;  %v392_v26 = vmul.f32 %v2454_v30, %v2454_v30  ;;  %v429_v28 = vsel %vm312_vm1, %v390_v9, 0.0  ;;  %v358_v9 = vsel %vm312_vm1, %v2562_v58, 0.0 }
  0x1f   : > { %v424_v14 = vadd.f32 %v423_v0, %v422_v3  ;;  %v439_v0 = vsel %vm312_vm1, %v395_v49, 0.0 }
  0x20   : > { %v329_v37 = vadd.f32 %v328_v29, %v327_v31  ;;  %v2530_v29 = vld [vmem:[%s2403_s10 + $0x98] sm:$0xff]  ;;  %v433_v43 = vsel %vm312_vm1, %v392_v26, 0.0 }
  0x21   : > { %v426_v23 = vadd.f32 %v425_v10, %v424_v14  ;;  %v398_v10 = vmul.f32 %v2506_v1, %v2506_v1  ;;  %v2578_v14 = vld [vmem:[%s2403_s10 + $0xc8] sm:$0xff] }
  0x22   : > { %v331_v41 = vadd.f32 %v330_v33, %v329_v37  ;;  %v2538_v37 = vld [vmem:[%s2403_s10 + $0xa0] sm:$0xff] }
  0x23   : > { %v428_v33 = vadd.f32 %v427_v19, %v426_v23  ;;  %v443_v23 = vsel %vm312_vm1, %v397_v63, 0.0  ;;  %v402_v49 = vmul.f32 %v2538_v37, %v2538_v37 }
  0x24   : > { %v333_v48 = vadd.f32 %v332_v38, %v331_v41  ;;  %v350_v41 = vsel %vm312_vm1, %v2530_v29, 0.0 }
  0x25   : > { %v430_v39 = vadd.f32 %v429_v28, %v428_v33  ;;  %v400_v33 = vmul.f32 %v2522_v20, %v2522_v20 }
  0x26   : > { %v335_v54 = vadd.f32 %v334_v42, %v333_v48  ;;  %v394_v42 = vmul.f32 %v2472_v40, %v2472_v40  ;;  %v352_v48 = vsel %vm312_vm1, %v2538_v37, 0.0 }
  0x27   : > { %v432_v46 = vadd.f32 %v431_v36, %v430_v39 }
  0x28   : > { %v337_v60 = vadd.f32 %v336_v50, %v335_v54  ;;  %v435_v50 = vsel %vm312_vm1, %v393_v35, 0.0  ;;  %v437_v57 = vsel %vm312_vm1, %v394_v42, 0.0  ;;  %v2594_v35 = vld [vmem:[%s2403_s10 + $0xd8] sm:$0xff] }
  0x29   : > { %v434_v54 = vadd.f32 %v433_v43, %v432_v46  ;;  %v2602_v43 = vld [vmem:[%s2403_s10 + $0xe0] sm:$0xff] }
  0x2a   : > { %v339_v2 = vadd.f32 %v338_v56, %v337_v60  ;;  %v396_v56 = vmul.f32 %v2490_v53, %v2490_v53 }
  0x2b   : > { %v436_v61 = vadd.f32 %v435_v50, %v434_v54  ;;  %v449_v50 = vsel %vm312_vm1, %v400_v33, 0.0 }
  0x2c   : > { %v341_v13 = vadd.f32 %v340_v62, %v339_v2  ;;  %v356_v62 = vsel %vm312_vm1, %v2554_v51, 0.0  ;;  %v2570_v2 = vld [vmem:[%s2403_s10 + $0xc0] sm:$0xff] }
  0x2d   : > { %v360_v19 = vsel %vm312_vm1, %v2570_v2, 0.0 }
  0x2e   : > { %v343_v22 = vadd.f32 %v342_v4, %v341_v13  ;;  %v438_v4 = vadd.f32 %v437_v57, %v436_v61  ;;  %v441_v13 = vsel %vm312_vm1, %v396_v56, 0.0  ;;  %v368_v56 = vsel %vm312_vm1, %v2602_v43, 0.0  ;;  %v2618_v61 = vld [vmem:[%s2403_s10 + $0xf0] sm:$0xff] }
  0x2f   : > { %v403_v57 = vmul.f32 %v2546_v44, %v2546_v44 }
  0x30   : > { %v345_v31 = vadd.f32 %v344_v16, %v343_v22  ;;  %v440_v17 = vadd.f32 %v439_v0, %v438_v4  ;;  %v399_v22 = vmul.f32 %v2514_v11, %v2514_v11  ;;  %v453_v4 = vsel %vm312_vm1, %v402_v49, 0.0 }
  0x31   : > { %v409_v49 = vmul.f32 %v2594_v35, %v2594_v35 }
  0x32   : > { %v347_v38 = vadd.f32 %v346_v25, %v345_v31  ;;  %v2586_v25 = vld [vmem:[%s2403_s10 + $0xd0] sm:$0xff]  ;;  %v442_v28 = vadd.f32 %v441_v13, %v440_v17  ;;  %v362_v31 = vsel %vm312_vm1, %v2578_v14, 0.0  ;;  %v447_v42 = vsel %vm312_vm1, %v399_v22, 0.0 }
  0x33   : > { %v364_v39 = vsel %vm312_vm1, %v2586_v25, 0.0  ;;  %v405_v17 = vmul.f32 %v2562_v58, %v2562_v58 }
  0x34   : > { %v349_v45 = vadd.f32 %v348_v34, %v347_v38  ;;  %v445_v34 = vsel %vm312_vm1, %v398_v10, 0.0  ;;  %v444_v38 = vadd.f32 %v443_v23, %v442_v28  ;;  %v406_v28 = vmul.f32 %v2570_v2, %v2570_v2 }
  0x36   : > { %v351_v52 = vadd.f32 %v350_v41, %v349_v45  ;;  %v401_v41 = vmul.f32 %v2530_v29, %v2530_v29  ;;  %v446_v46 = vadd.f32 %v445_v34, %v444_v38  ;;  %v459_v38 = vsel %vm312_vm1, %v405_v17, 0.0 }
  0x38   : > { %v353_v60 = vadd.f32 %v352_v48, %v351_v52  ;;  %v366_v48 = vsel %vm312_vm1, %v2594_v35, 0.0  ;;  %v2610_v52 = vld [vmem:[%s2403_s10 + $0xe8] sm:$0xff] }
  0x39   : > { %v370_v0 = vsel %vm312_vm1, %v2610_v52, 0.0 }
  0x3a   : > { %v355_v3 = vadd.f32 %v354_v55, %v353_v60  ;;  %v448_v55 = vadd.f32 %v447_v42, %v446_v46  ;;  %v451_v60 = vsel %vm312_vm1, %v401_v41, 0.0  ;;  %v408_v42 = vmul.f32 %v2586_v25, %v2586_v25 }
  0x3c   : > { %v357_v16 = vadd.f32 %v356_v62, %v355_v3  ;;  %v450_v63 = vadd.f32 %v449_v50, %v448_v55  ;;  %v404_v3 = vmul.f32 %v2554_v51, %v2554_v51 }
  0x3e   : > { %v359_v26 = vadd.f32 %v358_v9, %v357_v16  ;;  %v2626_v9 = vld [vmem:[%s2403_s10 + $0xf8] sm:$0xff]  ;;  %v452_v13 = vadd.f32 %v451_v60, %v450_v63  ;;  %v372_v16 = vsel %vm312_vm1, %v2618_v61, 0.0  ;;  %v411_v63 = vmul.f32 %v2610_v52, %v2610_v52 }
  0x40   : > { %v361_v36 = vadd.f32 %v360_v19, %v359_v26  ;;  %v455_v19 = vsel %vm312_vm1, %v403_v57, 0.0  ;;  %v454_v23 = vadd.f32 %v453_v4, %v452_v13  ;;  %v374_v26 = vsel %vm312_vm1, %v2626_v9, 0.0 }
  0x41   : > { %v465_v57 = vsel %vm312_vm1, %v408_v42, 0.0 }
  0x42   : > { %v363_v45 = vadd.f32 %v362_v31, %v361_v36  ;;  %v457_v31 = vsel %vm312_vm1, %v404_v3, 0.0  ;;  %v456_v34 = vadd.f32 %v455_v19, %v454_v23  ;;  %v407_v36 = vmul.f32 %v2578_v14, %v2578_v14 }
  0x43   : > { %v413_v19 = vmul.f32 %v2626_v9, %v2626_v9 }
  0x44   : > { %v365_v54 = vadd.f32 %v364_v39, %v363_v45  ;;  %v458_v41 = vadd.f32 %v457_v31, %v456_v34  ;;  %v461_v45 = vsel %vm312_vm1, %v406_v28, 0.0  ;;  %v463_v50 = vsel %vm312_vm1, %v407_v36, 0.0 }
  0x46   : > { %v367_v62 = vadd.f32 %v366_v48, %v365_v54  ;;  %v460_v48 = vadd.f32 %v459_v38, %v458_v41 }
  0x48   : > { %v369_v10 = vadd.f32 %v368_v56, %v367_v62  ;;  %v462_v55 = vadd.f32 %v461_v45, %v460_v48  ;;  %v410_v56 = vmul.f32 %v2602_v43, %v2602_v43  ;;  %v2178_v48 = vld [vmem:[%s3145_s6] sm:$0xff]  }
  0x49   : > { %2061 = vmatprep.subr.bf16.mxu1 %v2178_v48 }
  0x4a   : > { %v371_v22 = vadd.f32 %v370_v0, %v369_v10  ;;  %v464_v62 = vadd.f32 %v463_v50, %v462_v55  ;;  %v467_v0 = vsel %vm312_vm1, %v409_v49, 0.0  ;;  %v412_v10 = vmul.f32 %v2618_v61, %v2618_v61  ;;  %v2179_v49 = vld [vmem:[%s3144_s5] sm:$0xff]  }
  0x4b   : > { %v469_v13 = vsel %vm312_vm1, %v410_v56, 0.0  ;;  %2095 = vmatprep.subr.bf16.mxu0 %v2179_v49  ;;  %v634_v56 = vlaneseq }
  0x4c   : > { %v373_v33 = vadd.f32 %v372_v16, %v371_v22  ;;  %v466_v4 = vadd.f32 %v465_v57, %v464_v62  ;;  %v471_v22 = vsel %vm312_vm1, %v411_v63, 0.0  ;;  %v473_v28 = vsel %vm312_vm1, %v412_v10, 0.0 }
  0x4d   : > { %v635_v63 = vshrl.u32 %v634_v56, 7 }
  0x4e   : > { %v375_v39 = vadd.f32 %v374_v26, %v373_v33  ;;  %v468_v17 = vadd.f32 %v467_v0, %v466_v4  ;;  %v475_v33 = vsel %vm312_vm1, %v413_v19, 0.0 }
  0x4f   : > { %v636_v4 = vsub.s32 0, %v635_v63 }
  0x50   : > { %v376_v46 = vrot.slane %v375_v39, 4  ;;  %v470_v26 = vadd.f32 %v469_v13, %v468_v17 }
  0x52   : > { %v377_v54 = vadd.f32 %v376_v46, %v375_v39  ;;  %v472_v31 = vadd.f32 %v471_v22, %v470_v26 }
  0x54   : > { %v378_v60 = vrot.slane %v377_v54, 2  ;;  %v474_v34 = vadd.f32 %v473_v28, %v472_v31 }
  0x56   : > { %v379_v3 = vadd.f32 %v378_v60, %v377_v54  ;;  %v476_v36 = vadd.f32 %v475_v33, %v474_v34 }
  0x58   : > { %v380_v16 = vrot.slane %v379_v3, 1  ;;  %v477_v38 = vrot.slane %v476_v36, 4 }
  0x5a   : > { %v381_v23 = vadd.f32 %v380_v16, %v379_v3  ;;  %v478_v39 = vadd.f32 %v477_v38, %v476_v36  ;;  %v2714_v38 = vld [vmem:[%s3140_s1] ss:$0 sm:$0xff] }
  0x5c   : > { %2052 = vmatmul.mubr.msk.f32.vlgmr.msra.gmra.mrb[0].mxu0 %vm312_vm1, %v381_v23  ;;  %v479_v41 = vrot.slane %v478_v39, 2 }
  0x5d   : > { %2096 = vmatpush3.bf16.msra.mxu0 %v2179_v49 }
  0x5e   : > { %v480_v42 = vadd.f32 %v479_v41, %v478_v39 }
  0x60   : > { %v481_v45 = vrot.slane %v480_v42, 1 }
  0x62   : > { %v482_v46 = vadd.f32 %v481_v45, %v480_v42 }
  0x64   : > { %2059 = vmatmul.mubr.msk.f32.vlgmr.msra.gmra.mrb[0].mxu1 %vm312_vm1, %v482_v46 }
  0x65   : > { %2062 = vmatpush3.bf16.msra.mxu1 %v2178_v48 }
 0x12f   : > { %v554_v50 = vpop.f32.mrb[0].mxu0 }
 0x130   : > { %v2053_v54 = vpop.f32.mrb[1].mxu0  ;;  %v631_v55 = vmul.f32 %v554_v50, %v554_v50  ;;  %v2669_v10 = vrot.slane %v554_v50, %v636_v4 }
 0x132   : > { %v661_v17 = vsub.f32 %v2562_v58, %v2669_v10  ;;  %v662_v19 = vsub.f32 %v2570_v2, %v2669_v10  ;;  %v663_v22 = vsub.f32 %v2578_v14, %v2669_v10  ;;  %v664_v23 = vsub.f32 %v2586_v25, %v2669_v10 }
 0x133   : > { %v665_v26 = vsub.f32 %v2594_v35, %v2669_v10  ;;  %v666_v28 = vsub.f32 %v2602_v43, %v2669_v10  ;;  %v667_v31 = vsub.f32 %v2610_v52, %v2669_v10  ;;  %v668_v58 = vsub.f32 %v2618_v61, %v2669_v10 }
 0x134   : > { %v669_v2 = vsub.f32 %v2626_v9, %v2669_v10  ;;  %v638_v14 = vsub.f32 %v2406_v5, %v2669_v10  ;;  %v639_v25 = vsub.f32 %v2409_v6, %v2669_v10  ;;  %v640_v35 = vsub.f32 %v2412_v7, %v2669_v10 }
 0x135   : > { %v641_v43 = vsub.f32 %v2415_v8, %v2669_v10  ;;  %v642_v52 = vsub.f32 %v2424_v12, %v2669_v10  ;;  %v643_v9 = vsub.f32 %v2429_v15, %v2669_v10  ;;  %v644_v34 = vsub.f32 %v2434_v18, %v2669_v10 }
 0x136   : > { %v645_v36 = vsub.f32 %v2439_v21, %v2669_v10  ;;  %v646_v39 = vsub.f32 %v2444_v24, %v2669_v10  ;;  %v647_v41 = vsub.f32 %v2449_v27, %v2669_v10  ;;  %v648_v42 = vsub.f32 %v2454_v30, %v2669_v10 }
 0x137   : > { %v627_v57 = vpop.f32.mrb[0].mxu1  ;;  %v649_v45 = vsub.f32 %v2457_v32, %v2669_v10 }
 0x138   : > { %v632_v60 = vsub.f32 %v627_v57, %v631_v55  ;;  %v2060_v62 = vpop.f32.mrb[1].mxu1 }
 0x13a   : > { %v633_v0 = vmax.f32 %v632_v60, 0.0  ;;  %v2739_v60 = vld [vmem:[%s3141_s2] ss:$0 sm:$0xff] }
 0x13c   : > { %v670_v3 = vadd.f32 1e-05, %v633_v0 }
 0x13e   : > { %2180 = vrsqrt.f32 %v670_v3 }
 0x148   : > { %v2181_v33 = vpop.eup %2180 }
 0x149   : > { %v2703_v61 = vrot.slane %v2181_v33, %v636_v4  ;;  %v651_v33 = vsub.f32 %v2482_v47, %v2669_v10 }
 0x14b   : > { %v2725_v46 = vmul.f32 %v2703_v61, %v661_v17  ;;  %v2728_v48 = vmul.f32 %v2703_v61, %v662_v19  ;;  %v701_v49 = vmul.f32 %v2703_v61, %v663_v22  ;;  %v702_v50 = vmul.f32 %v2703_v61, %v664_v23  ;;  %v2762_v23 = vld [vmem:[%s3142_s3] ss:$0 sm:$0xff] }
 0x14c   : > { %v703_v54 = vmul.f32 %v2703_v61, %v665_v26  ;;  %v704_v55 = vmul.f32 %v2703_v61, %v666_v28  ;;  %v705_v56 = vmul.f32 %v2703_v61, %v667_v31  ;;  %v706_v57 = vmul.f32 %v2703_v61, %v668_v58 }
 0x14d   : > { %v707_v62 = vmul.f32 %v2703_v61, %v669_v2  ;;  %v2743_v63 = vmul.f32 %v2714_v38, %v701_v49  ;;  %v2746_v0 = vmul.f32 %v2714_v38, %v702_v50  ;;  %v676_v3 = vmul.f32 %v2703_v61, %v638_v14 }
 0x14e   : > { %v2750_v4 = vmul.f32 %v2714_v38, %v703_v54  ;;  %v2753_v17 = vmul.f32 %v2714_v38, %v704_v55  ;;  %v2756_v19 = vmul.f32 %v2714_v38, %v705_v56  ;;  %v745_v22 = vmul.f32 %v2714_v38, %v706_v57 }
 0x14f   : > { %v2765_v26 = vmul.f32 %v2714_v38, %v707_v62  ;;  %v677_v28 = vmul.f32 %v2703_v61, %v639_v25  ;;  %v715_v31 = vmul.f32 %v2714_v38, %v676_v3  ;;  %v678_v58 = vmul.f32 %v2703_v61, %v640_v35 }
 0x150   : > { %v784_v2 = vadd.f32 %v2739_v60, %v745_v22  ;;  %v650_v14 = vsub.f32 %v2472_v40, %v2669_v10  ;;  %v652_v49 = vsub.f32 %v2490_v53, %v2669_v10  ;;  %v679_v25 = vmul.f32 %v2703_v61, %v641_v43 }
 0x151   : > { %v716_v50 = vmul.f32 %v2714_v38, %v677_v28  ;;  %v754_v54 = vadd.f32 %v2739_v60, %v715_v31  ;;  %v653_v35 = vsub.f32 %v2498_v59, %v2669_v10  ;;  %v717_v56 = vmul.f32 %v2714_v38, %v678_v58 }
 0x152   : > { %v823_v55 = vmul.f32 %v2762_v23, %v784_v2  ;;  %v680_v40 = vmul.f32 %v2703_v61, %v642_v52  ;;  %v654_v57 = vsub.f32 %v2506_v1, %v2669_v10  ;;  %v718_v22 = vmul.f32 %v2714_v38, %v679_v25 }
 0x153   : > { %v755_v62 = vadd.f32 %v2739_v60, %v716_v50  ;;  %v793_v3 = vmul.f32 %v2762_v23, %v754_v54  ;;  %v655_v43 = vsub.f32 %v2514_v11, %v2669_v10  ;;  %v756_v31 = vadd.f32 %v2739_v60, %v717_v56 }
 0x154   : > { %v1903_v28 = vmul.f32 -1.442695, %v823_v55  ;;  %v681_v2 = vmul.f32 %v2703_v61, %v643_v9  ;;  %v719_v58 = vmul.f32 %v2714_v38, %v680_v40  ;;  %v757_v13 = vadd.f32 %v2739_v60, %v718_v22 }
 0x155   : > { %v794_v52 = vmul.f32 %v2762_v23, %v755_v62  ;;  %v1873_v16 = vmul.f32 -1.442695, %v793_v3  ;;  %v795_v54 = vmul.f32 %v2762_v23, %v756_v31  ;;  %v657_v56 = vsub.f32 %v2530_v29, %v2669_v10 }
 0x156   : > { %v720_v25 = vmul.f32 %v2714_v38, %v681_v2  ;;  %v758_v55 = vadd.f32 %v2739_v60, %v719_v58  ;;  %2182 = vpow2.f32 %v1903_v28  ;;  %v796_v40 = vmul.f32 %v2762_v23, %v757_v13 }
 0x157   : > { %v1874_v9 = vmul.f32 -1.442695, %v794_v52  ;;  %v682_v62 = vmul.f32 %v2703_v61, %v644_v34  ;;  %2184 = vpow2.f32 %v1873_v16  ;;  %v1875_v3 = vmul.f32 -1.442695, %v795_v54 }
 0x158   : > { %v759_v22 = vadd.f32 %v2739_v60, %v720_v25  ;;  %v797_v50 = vmul.f32 %v2762_v23, %v758_v55  ;;  %v1876_v31 = vmul.f32 -1.442695, %v796_v40  ;;  %v683_v2 = vmul.f32 %v2703_v61, %v645_v36 }
 0x159   : > { %2186 = vpow2.f32 %v1874_v9  ;;  %v721_v28 = vmul.f32 %v2714_v38, %v682_v62  ;;  %v684_v16 = vmul.f32 %v2703_v61, %v646_v39  ;;  %v685_v36 = vmul.f32 %v2703_v61, %v647_v41 }
 0x15a   : > { %2188 = vpow2.f32 %v1875_v3  ;;  %v798_v13 = vmul.f32 %v2762_v23, %v759_v22  ;;  %v1877_v58 = vmul.f32 -1.442695, %v797_v50  ;;  %v722_v34 = vmul.f32 %v2714_v38, %v683_v2 }
 0x15b   : > { %2190 = vpow2.f32 %v1876_v31  ;;  %v760_v52 = vadd.f32 %v2739_v60, %v721_v28  ;;  %v723_v25 = vmul.f32 %v2714_v38, %v684_v16  ;;  %v686_v50 = vmul.f32 %v2703_v61, %v648_v42 }
 0x15c   : > { %2192 = vpow2.f32 %v1877_v58  ;;  %v1878_v54 = vmul.f32 -1.442695, %v798_v13  ;;  %v761_v39 = vadd.f32 %v2739_v60, %v722_v34  ;;  %v724_v9 = vmul.f32 %v2714_v38, %v685_v36 }
 0x15d   : > { %v799_v55 = vmul.f32 %v2762_v23, %v760_v52  ;;  %v687_v41 = vmul.f32 %v2703_v61, %v649_v45  ;;  %v762_v40 = vadd.f32 %v2739_v60, %v723_v25  ;;  %v725_v62 = vmul.f32 %v2714_v38, %v686_v50 }
 0x15e   : > { %2194 = vpow2.f32 %v1878_v54  ;;  %v688_v30 = vmul.f32 %v2703_v61, %v650_v14  ;;  %v800_v42 = vmul.f32 %v2762_v23, %v761_v39  ;;  %v763_v22 = vadd.f32 %v2739_v60, %v724_v9 }
 0x15f   : > { %v1879_v3 = vmul.f32 -1.442695, %v799_v55  ;;  %v726_v31 = vmul.f32 %v2714_v38, %v687_v41  ;;  %v801_v2 = vmul.f32 %v2762_v23, %v762_v40  ;;  %v764_v32 = vadd.f32 %v2739_v60, %v725_v62 }
 0x160   : > { %v689_v45 = vmul.f32 %v2703_v61, %v651_v33  ;;  %v727_v28 = vmul.f32 %v2714_v38, %v688_v30  ;;  %v2849_v13 = vpop.eup %2182  ;;  %v1880_v14 = vmul.f32 -1.442695, %v800_v42  ;;  %v802_v58 = vmul.f32 %v2762_v23, %v763_v22 }
 0x161   : > { %2196 = vpow2.f32 %v1879_v3  ;;  %v765_v16 = vadd.f32 %v2739_v60, %v726_v31  ;;  %v2185_v34 = vpop.eup %2184  ;;  %v1881_v52 = vmul.f32 -1.442695, %v801_v2  ;;  %v803_v36 = vmul.f32 %v2762_v23, %v764_v32 }
 0x162   : > { %v728_v54 = vmul.f32 %v2714_v38, %v689_v45  ;;  %v766_v47 = vadd.f32 %v2739_v60, %v727_v28  ;;  %v785_v33 = vadd.f32 %v2739_v60, %v2765_v26  ;;  %v921_v50 = vadd.f32 1.0, %v2185_v34 }
 0x163   : > { %v2187_v25 = vpop.eup %2186  ;;  %2198 = vpow2.f32 %v1880_v14  ;;  %v804_v39 = vmul.f32 %v2762_v23, %v765_v16  ;;  %v1882_v41 = vmul.f32 -1.442695, %v802_v58  ;;  %v1883_v42 = vmul.f32 -1.442695, %v803_v36 }
 0x164   : > { %v2189_v55 = vpop.eup %2188  ;;  %v922_v9 = vadd.f32 1.0, %v2187_v25  ;;  %2200 = vpow2.f32 %v1881_v52  ;;  %v767_v40 = vadd.f32 %v2739_v60, %v728_v54  ;;  %v805_v3 = vmul.f32 %v2762_v23, %v766_v47 }
 0x165   : > { %v2191_v62 = vpop.eup %2190  ;;  %2202 = vrcp.f32 %v921_v50  ;;  %v923_v30 = vadd.f32 1.0, %v2189_v55  ;;  %v1884_v26 = vmul.f32 -1.442695, %v804_v39  ;;  %v690_v2 = vmul.f32 %v2703_v61, %v652_v49 }
 0x166   : > { %v2193_v22 = vpop.eup %2192  ;;  %2204 = vrcp.f32 %v922_v9  ;;  %v924_v31 = vadd.f32 1.0, %v2191_v62  ;;  %v806_v45 = vmul.f32 %v2762_v23, %v767_v40  ;;  %v691_v28 = vmul.f32 %v2703_v61, %v653_v35 }
 0x167   : > { %2206 = vrcp.f32 %v923_v30  ;;  %v925_v32 = vadd.f32 1.0, %v2193_v22  ;;  %v1885_v58 = vmul.f32 -1.442695, %v805_v3  ;;  %v729_v16 = vmul.f32 %v2714_v38, %v690_v2 }
 0x168   : > { %v2195_v14 = vpop.eup %2194  ;;  %2208 = vrcp.f32 %v924_v31  ;;  %v692_v53 = vmul.f32 %v2703_v61, %v654_v57  ;;  %v730_v34 = vmul.f32 %v2714_v38, %v691_v28  ;;  %v693_v59 = vmul.f32 %v2703_v61, %v655_v43 }
 0x169   : > { %v926_v49 = vadd.f32 1.0, %v2195_v14  ;;  %2210 = vrcp.f32 %v925_v32  ;;  %v768_v35 = vadd.f32 %v2739_v60, %v729_v16  ;;  %v3147_v36 = vsub.f32 %v2522_v20, %v2669_v10 }
 0x16a   : > { %2212 = vpow2.f32 %v1882_v41  ;;  %v731_v52 = vmul.f32 %v2714_v38, %v692_v53  ;;  %v769_v54 = vadd.f32 %v2739_v60, %v730_v34  ;;  %v732_v47 = vmul.f32 %v2714_v38, %v693_v59 }
 0x16b   : > { %v694_v1 = vmul.f32 %v2703_v61, %v3147_v36  ;;  %v2197_v57 = vpop.eup %2196  ;;  %2214 = vrcp.f32 %v926_v49  ;;  %v695_v11 = vmul.f32 %v2703_v61, %v657_v56  ;;  %v658_v20 = vsub.f32 %v2538_v37, %v2669_v10 }
 0x16c   : > { %v927_v43 = vadd.f32 1.0, %v2197_v57  ;;  %2216 = vpow2.f32 %v1883_v42  ;;  %v770_v25 = vadd.f32 %v2739_v60, %v731_v52  ;;  %v2896_v39 = vmul.f32 %v2762_v23, %v785_v33 }
 0x16d   : > { %v2199_v50 = vpop.eup %2198  ;;  %2218 = vpow2.f32 %v1884_v26  ;;  %v2898_v55 = vmul.f32 -1.442695, %v806_v45  ;;  %v771_v9 = vadd.f32 %v2739_v60, %v732_v47  ;;  %v2902_v56 = vmul.f32 %v2762_v23, %v768_v35 }
 0x16e   : > { %v2201_v41 = vpop.eup %2200  ;;  %v928_v29 = vadd.f32 1.0, %v2199_v50  ;;  %2220 = vrcp.f32 %v927_v43  ;;  %v2905_v40 = vmul.f32 %v2762_v23, %v769_v54  ;;  %v2908_v33 = vmul.f32 %v2762_v23, %v770_v25 }
 0x16f   : > { %v2203_v62 = vpop.eup %2202  ;;  %v929_v30 = vadd.f32 1.0, %v2201_v41  ;;  %2222 = vpow2.f32 %v1885_v58  ;;  %v2911_v42 = vmul.f32 %v2714_v38, %v694_v1  ;;  %v2914_v22 = vmul.f32 %v2762_v23, %v771_v9 }
 0x170   : > { %v2205_v3 = vpop.eup %2204  ;;  %vm1017_vm2 = vcmp.gt.f32.partialorder %v2203_v62, 0.5  ;;  %2224 = vrcp.f32 %v928_v29  ;;  %v2917_v31 = vmul.f32 %v2714_v38, %v695_v11  ;;  %v738_v37 = vmul.f32 %v2714_v38, %v2725_v46 }
 0x171   : > { %v2207_v26 = vpop.eup %2206  ;;  %vm1018_vm3 = vcmp.gt.f32.partialorder %v2205_v3, 0.5  ;;  %v1081_v2 = vsel %vm1017_vm2, 0.0, %v2203_v62  ;;  %v1049_v32 = vsel %vm1017_vm2, 1.0, %v2203_v62  ;;  %2226 = vrcp.f32 %v929_v30 }
 0x172   : > { %v2209_v45 = vpop.eup %2208  ;;  %v1082_v28 = vsel %vm1018_vm3, 0.0, %v2205_v3  ;;  %v1161_v14 = vmul.f32 %v1081_v2, %v2406_v5  ;;  %v1050_v58 = vsel %vm1018_vm3, 1.0, %v2205_v3  ;;  %v1113_v16 = vmul.f32 %v1049_v32, %v2406_v5 }
 0x173   : > { %v2211_v53 = vpop.eup %2210  ;;  %v1162_v49 = vmul.f32 %v1082_v28, %v2409_v6  ;;  %v1114_v34 = vmul.f32 %v1050_v58, %v2409_v6  ;;  %vm1019_vm4 = vcmp.gt.f32.partialorder %v2207_v26, 0.5  ;;  %vm1020_vm5 = vcmp.gt.f32.partialorder %v2209_v45, 0.5 }
 0x174   : > { %v2213_v59 = vpop.eup %2212  ;;  %v1083_v35 = vsel %vm1019_vm4, 0.0, %v2207_v26  ;;  %v1084_v52 = vsel %vm1020_vm5, 0.0, %v2209_v45  ;;  %v1051_v36 = vsel %vm1019_vm4, 1.0, %v2207_v26  ;;  %v1052_v1 = vsel %vm1020_vm5, 1.0, %v2209_v45 }
 0x175   : > { %v2215_v57 = vpop.eup %2214  ;;  %v1193_v54 = vpack.c.bf16 %v1162_v49, %v1161_v14  ;;  %v1145_v47 = vpack.c.bf16 %v1114_v34, %v1113_v16  ;;  %v1163_v11 = vmul.f32 %v1083_v35, %v2412_v7  ;;  %v1164_v43 = vmul.f32 %v1084_v52, %v2415_v8 }
 0x176   : > { %v2217_v5 = vpop.eup %2216  ;;  %v1115_v25 = vmul.f32 %v1051_v36, %v2412_v7  ;;  %v1116_v50 = vmul.f32 %v1052_v1, %v2415_v8  ;;  %vm1021_vm6 = vcmp.gt.f32.partialorder %v2211_v53, 0.5  ;;  %vm1022_vm7 = vcmp.gt.f32.partialorder %v2215_v57, 0.5 }
 0x177   : > { %v2219_v6 = vpop.eup %2218  ;;  %2063 = vmatprep.mubr.msk.bf16.mxu1 %vm312_vm1, %v1193_v54  ;;  %2097 = vmatprep.mubr.msk.bf16.mxu0 %vm312_vm1, %v1145_v47  ;;  %v1194_v9 = vpack.c.bf16 %v1164_v43, %v1163_v11  ;;  %v1085_v41 = vsel %vm1021_vm6, 0.0, %v2211_v53  ;;  %v1086_v29 = vsel %vm1022_vm7, 0.0, %v2215_v57  ;;  %v1053_v62 = vsel %vm1021_vm6, 1.0, %v2211_v53 }
 0x178   : > { %v2221_v30 = vpop.eup %2220  ;;  %v1146_v3 = vpack.c.bf16 %v1116_v50, %v1115_v25  ;;  %v1165_v26 = vmul.f32 %v1085_v41, %v2424_v12  ;;  %v1166_v2 = vmul.f32 %v1086_v29, %v2429_v15  ;;  %v1054_v7 = vsel %vm1022_vm7, 1.0, %v2215_v57 }
 0x179   : > { %v2223_v32 = vpop.eup %2222  ;;  %2064 = vmatmul.mubr.msk.bf16.vlgmr.msra.gmra.mrb[4].mxu1 %vm312_vm1, %v1194_v9  ;;  %v1117_v8 = vmul.f32 %v1053_v62, %v2424_v12  ;;  %v1118_v45 = vmul.f32 %v1054_v7, %v2429_v15  ;;  %vm1023_vm8 = vcmp.gt.f32.partialorder %v2221_v30, 0.5  ;;  %v930_v28 = vadd.f32 1.0, %v2213_v59 }
 0x17a   : > { %v2225_v14 = vpop.eup %2224  ;;  %2098 = vmatmul.mubr.msk.bf16.vlgmr.msra.gmra.mrb[4].mxu0 %vm312_vm1, %v1146_v3  ;;  %v1195_v58 = vpack.c.bf16 %v1166_v2, %v1165_v26  ;;  %v1087_v16 = vsel %vm1023_vm8, 0.0, %v2221_v30  ;;  %v1055_v53 = vsel %vm1023_vm8, 1.0, %v2221_v30  ;;  %v931_v49 = vadd.f32 1.0, %v2217_v5 }
 0x17b   : > { %v2227_v34 = vpop.eup %2226  ;;  %v1147_v35 = vpack.c.bf16 %v1118_v45, %v1117_v8  ;;  %vm1024_vm9 = vcmp.gt.f32.partialorder %v2225_v14, 0.5  ;;  %v1167_v52 = vmul.f32 %v1087_v16, %v2434_v18  ;;  %v1119_v36 = vmul.f32 %v1055_v53, %v2434_v18 }
 0x17c   : > { %2067 = vmatprep.mubr.msk.bf16.mxu1 %vm312_vm1, %v1195_v58  ;;  %v1088_v12 = vsel %vm1024_vm9, 0.0, %v2225_v14  ;;  %v1056_v15 = vsel %vm1024_vm9, 1.0, %v2225_v14  ;;  %2228 = vrcp.f32 %v930_v28  ;;  %vm1025_vm10 = vcmp.gt.f32.partialorder %v2227_v34, 0.5 }
 0x17d   : > { %2101 = vmatprep.mubr.msk.bf16.mxu0 %vm312_vm1, %v1147_v35  ;;  %v1168_v59 = vmul.f32 %v1088_v12, %v2439_v21  ;;  %v1120_v1 = vmul.f32 %v1056_v15, %v2439_v21  ;;  %v1887_v57 = vmul.f32 -1.442695, %v2902_v56  ;;  %v1888_v54 = vmul.f32 -1.442695, %v2905_v40 }
 0x17e   : > { %v1089_v47 = vsel %vm1025_vm10, 0.0, %v2227_v34  ;;  %v932_v11 = vadd.f32 1.0, %v2219_v6  ;;  %2230 = vrcp.f32 %v931_v49  ;;  %v1889_v18 = vmul.f32 -1.442695, %v2908_v33 }
 0x17f   : > { %v1196_v43 = vpack.c.bf16 %v1168_v59, %v1167_v52  ;;  %v1148_v5 = vpack.c.bf16 %v1120_v1, %v1119_v36  ;;  %2232 = vpow2.f32 %v2898_v55  ;;  %v933_v25 = vadd.f32 1.0, %v2223_v32  ;;  %v2310_v36 = vld [vmem:[%s2403_s10 + $0x50] sm:$0xff] }
 0x180   : > { %2234 = vrcp.f32 %v932_v11  ;;  %v1890_v50 = vmul.f32 -1.442695, %v2914_v22  ;;  %v772_v21 = vadd.f32 %v2739_v60, %v2911_v42  ;;  %v773_v56 = vadd.f32 %v2739_v60, %v2917_v31 }
 0x181   : > { %2068 = vmatmul.mubr.msk.bf16.gmra.mrb[8].mxu1 %vm312_vm1, %v1196_v43  ;;  %2236 = vrcp.f32 %v933_v25  ;;  %v696_v40 = vmul.f32 %v2703_v61, %v658_v20  ;;  %v3148_v55 = vsub.f32 %v2546_v44, %v2669_v10  ;;  %v3149_v22 = vsub.f32 %v2554_v51, %v2669_v10 }
 0x182   : > { %2102 = vmatmul.mubr.msk.bf16.gmra.mrb[8].mxu0 %vm312_vm1, %v1148_v5  ;;  %2238 = vpow2.f32 %v1887_v57  ;;  %v811_v31 = vmul.f32 %v2762_v23, %v772_v21  ;;  %v812_v6 = vmul.f32 %v2762_v23, %v773_v56  ;;  %v1057_v51 = vsel %vm1025_vm10, 1.0, %v2227_v34 }
 0x183   : > { %v697_v33 = vmul.f32 %v2703_v61, %v3148_v55  ;;  %v698_v42 = vmul.f32 %v2703_v61, %v3149_v22  ;;  %2240 = vpow2.f32 %v1888_v54  ;;  %v735_v44 = vmul.f32 %v2714_v38, %v696_v40  ;;  %v2311_v54 = vld [vmem:[%s2403_s10 + $0x58] sm:$0xff] }
 0x184   : > { %2242 = vpow2.f32 %v1889_v18  ;;  %v1891_v10 = vmul.f32 -1.442695, %v811_v31  ;;  %v1892_v61 = vmul.f32 -1.442695, %v812_v6  ;;  %v1904_v46 = vmul.f32 -1.442695, %v2896_v39 }
 0x185   : > { %v736_v20 = vmul.f32 %v2714_v38, %v697_v33  ;;  %v737_v9 = vmul.f32 %v2714_v38, %v698_v42  ;;  %2244 = vpow2.f32 %v1890_v50  ;;  %v774_v41 = vadd.f32 %v2739_v60, %v735_v44 }
 0x186   : > { %v2229_v62 = vpop.eup %2228  ;;  %v1169_v30 = vmul.f32 %v1089_v47, %v2444_v24  ;;  %2246 = vpow2.f32 %v1891_v10  ;;  %v739_v3 = vmul.f32 %v2714_v38, %v2728_v48  ;;  %v1121_v26 = vmul.f32 %v1057_v51, %v2444_v24 }
 0x187   : > { %v775_v29 = vadd.f32 %v2739_v60, %v736_v20  ;;  %vm1026_vm11 = vcmp.gt.f32.partialorder %v2229_v62, 0.5  ;;  %2248 = vpow2.f32 %v1892_v61  ;;  %v813_v2 = vmul.f32 %v2762_v23, %v774_v41 }
 0x188   : > { %v2231_v7 = vpop.eup %2230  ;;  %v1090_v32 = vsel %vm1026_vm11, 0.0, %v2229_v62  ;;  %v1058_v8 = vsel %vm1026_vm11, 1.0, %v2229_v62  ;;  %v776_v45 = vadd.f32 %v2739_v60, %v737_v9  ;;  %v777_v39 = vadd.f32 %v2739_v60, %v738_v37 }
 0x189   : > { %v2233_v28 = vpop.eup %2232  ;;  %v1170_v14 = vmul.f32 %v1090_v32, %v2449_v27  ;;  %v1122_v58 = vmul.f32 %v1058_v8, %v2449_v27  ;;  %vm1027_vm12 = vcmp.gt.f32.partialorder %v2231_v7, 0.5  ;;  %v814_v38 = vmul.f32 %v2762_v23, %v775_v29 }
 0x18a   : > { %v2235_v24 = vpop.eup %2234  ;;  %v1091_v48 = vsel %vm1027_vm12, 0.0, %v2231_v7  ;;  %v1059_v16 = vsel %vm1027_vm12, 1.0, %v2231_v7  ;;  %v934_v53 = vadd.f32 1.0, %v2233_v28  ;;  %v1893_v49 = vmul.f32 -1.442695, %v813_v2  ;;  %v2312_v2 = vld [vmem:[%s2403_s10 + $0x60] sm:$0xff] }
 0x18b   : > { %v2237_v34 = vpop.eup %2236  ;;  %v1197_v35 = vpack.c.bf16 %v1170_v14, %v1169_v30  ;;  %v1149_v52 = vpack.c.bf16 %v1122_v58, %v1121_v26  ;;  %vm1028_vm13 = vcmp.gt.f32.partialorder %v2235_v24, 0.5  ;;  %v1171_v12 = vmul.f32 %v2310_v36, %v1091_v48  ;;  %v2313_v14 = vld [vmem:[%s2403_s10 + $0x68] sm:$0xff] }
 0x18c   : > { %v2239_v15 = vpop.eup %2238  ;;  %v1092_v59 = vsel %vm1028_vm13, 0.0, %v2235_v24  ;;  %v1060_v1 = vsel %vm1028_vm13, 1.0, %v2235_v24  ;;  %v1123_v57 = vmul.f32 %v2310_v36, %v1059_v16  ;;  %2250 = vrcp.f32 %v934_v53 }
 0x18d   : > { %v2241_v27 = vpop.eup %2240  ;;  %2252 = vpow2.f32 %v1904_v46  ;;  %2071 = vmatprep.mubr.msk.bf16.mxu1 %vm312_vm1, %v1197_v35  ;;  %2105 = vmatprep.mubr.msk.bf16.mxu0 %vm312_vm1, %v1149_v52  ;;  %v1172_v47 = vmul.f32 %v2311_v54, %v1092_v59  ;;  %v1124_v11 = vmul.f32 %v2311_v54, %v1060_v1  ;;  %v935_v18 = vadd.f32 1.0, %v2239_v15 }
 0x18e   : > { %v2243_v43 = vpop.eup %2242  ;;  %v936_v5 = vadd.f32 1.0, %v2241_v27  ;;  %2254 = vpow2.f32 %v1893_v49  ;;  %v779_v25 = vadd.f32 %v2739_v60, %v2743_v63  ;;  %v815_v40 = vmul.f32 %v2762_v23, %v776_v45  ;;  %v2315_v27 = vld [vmem:[%s2403_s10 + $0x78] sm:$0xff] }
 0x18f   : > { %v2245_v50 = vpop.eup %2244  ;;  %v1198_v21 = vpack.c.bf16 %v1172_v47, %v1171_v12  ;;  %v1150_v56 = vpack.c.bf16 %v1124_v11, %v1123_v57  ;;  %v816_v55 = vmul.f32 %v2762_v23, %v777_v39  ;;  %2256 = vrcp.f32 %v935_v18 }
 0x190   : > { %v2247_v33 = vpop.eup %2246  ;;  %v937_v22 = vadd.f32 1.0, %v2243_v43  ;;  %v938_v42 = vadd.f32 1.0, %v2245_v50  ;;  %v1894_v31 = vmul.f32 -1.442695, %v814_v38  ;;  %vm1029_vm14 = vcmp.gt.f32.partialorder %v2237_v34, 0.5 }
 0x191   : > { %v2249_v6 = vpop.eup %2248  ;;  %2072 = vmatmul.mubr.msk.bf16.gmra.mrb[12].mxu1 %vm312_vm1, %v1198_v21  ;;  %2106 = vmatmul.mubr.msk.bf16.gmra.mrb[12].mxu0 %vm312_vm1, %v1150_v56  ;;  %2258 = vrcp.f32 %v936_v5  ;;  %v939_v63 = vadd.f32 1.0, %v2247_v33  ;;  %v778_v37 = vadd.f32 %v2739_v60, %v739_v3  ;;  %v818_v20 = vmul.f32 %v2762_v23, %v779_v25  ;;  %v2317_v33 = vld [vmem:[%s2403_s10 + $0x88] sm:$0xff] }
 0x192   : > { %2260 = vrcp.f32 %v937_v22  ;;  %v940_v44 = vadd.f32 1.0, %v2249_v6  ;;  %v780_v9 = vadd.f32 %v2739_v60, %v2746_v0  ;;  %v1895_v51 = vmul.f32 -1.442695, %v815_v40  ;;  %v2316_v40 = vld [vmem:[%s2403_s10 + $0x80] sm:$0xff] }
 0x193   : > { %2262 = vrcp.f32 %v938_v42  ;;  %v1896_v10 = vmul.f32 -1.442695, %v816_v55  ;;  %v817_v61 = vmul.f32 %v2762_v23, %v778_v37  ;;  %v1093_v41 = vsel %vm1029_vm14, 0.0, %v2237_v34 }
 0x194   : > { %v1061_v29 = vsel %vm1029_vm14, 1.0, %v2237_v34  ;;  %2264 = vrcp.f32 %v939_v63  ;;  %v819_v62 = vmul.f32 %v2762_v23, %v780_v9  ;;  %v781_v3 = vadd.f32 %v2739_v60, %v2750_v4 }
 0x195   : > { %2266 = vrcp.f32 %v940_v44  ;;  %v1897_v46 = vmul.f32 -1.442695, %v817_v61  ;;  %v1898_v0 = vmul.f32 -1.442695, %v818_v20  ;;  %v1173_v7 = vmul.f32 %v2312_v2, %v1093_v41  ;;  %v2318_v61 = vld [vmem:[%s2403_s10 + $0x90] sm:$0xff] }
 0x196   : > { %v2251_v30 = vpop.eup %2250  ;;  %2268 = vpow2.f32 %v1894_v31  ;;  %v1125_v32 = vmul.f32 %v2312_v2, %v1061_v29  ;;  %v1899_v28 = vmul.f32 -1.442695, %v819_v62  ;;  %v3010_v48 = vadd.f32 %v2739_v60, %v2753_v17  ;;  %v2319_v29 = vld [vmem:[%s2403_s10 + $0x98] sm:$0xff] }
 0x197   : > { %v3004_v26 = vpop.eup %2252  ;;  %vm1030_vm15 = vcmp.gt.f32.partialorder %v2251_v30, 0.5  ;;  %2270 = vpow2.f32 %v1895_v51  ;;  %v3014_v16 = vadd.f32 %v2739_v60, %v2756_v19  ;;  %v3017_v53 = vmul.f32 %v2762_v23, %v781_v3  ;;  %v2314_v19 = vld [vmem:[%s2403_s10 + $0x70] sm:$0xff] }
 0x198   : > { %v2255_v8 = vpop.eup %2254  ;;  %v1094_v45 = vsel %vm1030_vm15, 0.0, %v2251_v30  ;;  %v1062_v39 = vsel %vm1030_vm15, 1.0, %v2251_v30  ;;  %2272 = vpow2.f32 %v1896_v10 }
 0x199   : > { %v1174_v58 = vmul.f32 %v2313_v14, %v1094_v45  ;;  %v1126_v38 = vmul.f32 %v2313_v14, %v1062_v39  ;;  %v941_v24 = vadd.f32 1.0, %v2255_v8  ;;  %2274 = vpow2.f32 %v1897_v46  ;;  %v2257_v4 = vpop.eup %2256 }
 0x19a   : > { %2276 = vpow2.f32 %v1898_v0  ;;  %vm1031_vm0 = vcmp.gt.f32.partialorder %v2257_v4, 0.5 }
 0x19b   : > { %v2259_v49 = vpop.eup %2258  ;;  %v1199_v34 = vpack.c.bf16 %v1174_v58, %v1173_v7  ;;  %v1151_v35 = vpack.c.bf16 %v1126_v38, %v1125_v32  ;;  %2278 = vrcp.f32 %v941_v24  ;;  %v1095_v36 = vsel %vm1031_vm0, 0.0, %v2257_v4 }
 0x19c   : > { %v2261_v52 = vpop.eup %2260  ;;  %vm1032_vm2 = vcmp.gt.f32.partialorder %v2259_v49, 0.5  ;;  %v1063_v17 = vsel %vm1031_vm0, 1.0, %v2257_v4  ;;  %2280 = vpow2.f32 %v1899_v28  ;;  %v1175_v15 = vmul.f32 %v2314_v19, %v1095_v36 }
 0x19d   : > { %v2263_v12 = vpop.eup %2262  ;;  %2075 = vmatprep.mubr.msk.bf16.mxu1 %vm312_vm1, %v1199_v34  ;;  %2109 = vmatprep.mubr.msk.bf16.mxu0 %vm312_vm1, %v1151_v35  ;;  %v1096_v60 = vsel %vm1032_vm2, 0.0, %v2259_v49  ;;  %v1064_v59 = vsel %vm1032_vm2, 1.0, %v2259_v49  ;;  %v1127_v1 = vmul.f32 %v2314_v19, %v1063_v17  ;;  %vm1033_vm3 = vcmp.gt.f32.partialorder %v2261_v52, 0.5  ;;  %v2320_v17 = vld [vmem:[%s2403_s10 + $0xa0] sm:$0xff] }
 0x19e   : > { %v2265_v57 = vpop.eup %2264  ;;  %v1176_v54 = vmul.f32 %v2315_v27, %v1096_v60  ;;  %v1128_v47 = vmul.f32 %v2315_v27, %v1064_v59  ;;  %vm1034_vm4 = vcmp.gt.f32.partialorder %v2263_v12, 0.5  ;;  %v1097_v18 = vsel %vm1033_vm3, 0.0, %v2261_v52  ;;  %v2321_v59 = vld [vmem:[%s2403_s10 + $0xa8] sm:$0xff] }
 0x19f   : > { %v2267_v11 = vpop.eup %2266  ;;  %v1098_v43 = vsel %vm1034_vm4, 0.0, %v2263_v12  ;;  %v1065_v5 = vsel %vm1033_vm3, 1.0, %v2261_v52  ;;  %v1066_v25 = vsel %vm1034_vm4, 1.0, %v2263_v12  ;;  %v1177_v55 = vmul.f32 %v2316_v40, %v1097_v18 }
 0x1a0   : > { %v2269_v50 = vpop.eup %2268  ;;  %v1200_v21 = vpack.c.bf16 %v1176_v54, %v1175_v15  ;;  %v1152_v56 = vpack.c.bf16 %v1128_v47, %v1127_v1  ;;  %v1178_v22 = vmul.f32 %v2317_v33, %v1098_v43  ;;  %v1129_v31 = vmul.f32 %v2316_v40, %v1065_v5 }
 0x1a1   : > { %v2271_v42 = vpop.eup %2270  ;;  %v1130_v6 = vmul.f32 %v2317_v33, %v1066_v25  ;;  %vm1035_vm5 = vcmp.gt.f32.partialorder %v2265_v57, 0.5  ;;  %vm1036_vm6 = vcmp.gt.f32.partialorder %v2267_v11, 0.5  ;;  %v942_v2 = vadd.f32 1.0, %v2269_v50 }
 0x1a2   : > { %v2273_v63 = vpop.eup %2272  ;;  %2076 = vmatmul.mubr.msk.bf16.gmra.mrb[16].mxu1 %vm312_vm1, %v1200_v21  ;;  %2110 = vmatmul.mubr.msk.bf16.gmra.mrb[16].mxu0 %vm312_vm1, %v1152_v56  ;;  %v1201_v37 = vpack.c.bf16 %v1178_v22, %v1177_v55  ;;  %v1099_v44 = vsel %vm1035_vm5, 0.0, %v2265_v57  ;;  %v1100_v20 = vsel %vm1036_vm6, 0.0, %v2267_v11  ;;  %v1067_v9 = vsel %vm1035_vm5, 1.0, %v2265_v57  ;;  %v2323_v56 = vld [vmem:[%s2403_s10 + $0xb8] sm:$0xff] }
 0x1a3   : > { %v2275_v51 = vpop.eup %2274  ;;  %v1153_v10 = vpack.c.bf16 %v1130_v6, %v1129_v31  ;;  %v1179_v41 = vmul.f32 %v2318_v61, %v1099_v44  ;;  %v1180_v62 = vmul.f32 %v2319_v29, %v1100_v20  ;;  %v1068_v46 = vsel %vm1036_vm6, 1.0, %v2267_v11  ;;  %v2322_v11 = vld [vmem:[%s2403_s10 + $0xb0] sm:$0xff] }
 0x1a4   : > { %v2277_v30 = vpop.eup %2276  ;;  %2079 = vmatprep.mubr.msk.bf16.mxu1 %vm312_vm1, %v1201_v37  ;;  %v1131_v3 = vmul.f32 %v2318_v61, %v1067_v9  ;;  %v1132_v0 = vmul.f32 %v2319_v29, %v1068_v46  ;;  %v943_v7 = vadd.f32 1.0, %v2271_v42  ;;  %v944_v45 = vadd.f32 1.0, %v2273_v63  ;;  %v2325_v61 = vld [vmem:[%s2403_s10 + $0xc8] sm:$0xff] }
 0x1a5   : > { %v2279_v32 = vpop.eup %2278  ;;  %2113 = vmatprep.mubr.msk.bf16.mxu0 %vm312_vm1, %v1153_v10  ;;  %v1202_v8 = vpack.c.bf16 %v1180_v62, %v1179_v41  ;;  %v945_v39 = vadd.f32 1.0, %v2275_v51  ;;  %v821_v28 = vmul.f32 %v2762_v23, %v3010_v48  ;;  %v822_v58 = vmul.f32 %v2762_v23, %v3014_v16  ;;  %v2324_v51 = vld [vmem:[%s2403_s10 + $0xc0] sm:$0xff] }
 0x1a6   : > { %v2281_v14 = vpop.eup %2280  ;;  %v1154_v38 = vpack.c.bf16 %v1132_v0, %v1131_v3  ;;  %2282 = vrcp.f32 %v942_v2  ;;  %v946_v24 = vadd.f32 1.0, %v2277_v30  ;;  %v1900_v4 = vmul.f32 -1.442695, %v3017_v53 }
 0x1a7   : > { %2284 = vrcp.f32 %v943_v7  ;;  %v947_v49 = vadd.f32 1.0, %v2281_v14  ;;  %v1901_v34 = vmul.f32 -1.442695, %v821_v28  ;;  %v1902_v48 = vmul.f32 -1.442695, %v822_v58  ;;  %v2326_v28 = vld [vmem:[%s2403_s10 + $0xf0] sm:$0xff] }
 0x1a8   : > { %2286 = vrcp.f32 %v944_v45  ;;  %vm1037_vm7 = vcmp.gt.f32.partialorder %v2279_v32, 0.5  ;;  %v951_v23 = vadd.f32 1.0, %v2849_v13  ;;  %v952_v16 = vadd.f32 1.0, %v3004_v26  ;;  %v2327_v58 = vld [vmem:[%s2403_s10 + $0xf8] sm:$0xff] }
 0x1a9   : > { %2288 = vrcp.f32 %v945_v39  ;;  %v1101_v53 = vsel %vm1037_vm7, 0.0, %v2279_v32  ;;  %v1069_v35 = vsel %vm1037_vm7, 1.0, %v2279_v32  ;;  %vm1771_vm4 = vcmask 60416  }
 0x1aa   : > { %2080 = vmatmul.mubr.msk.bf16.gmra.mrb[20].mxu1 %vm312_vm1, %v1202_v8  ;;  %2114 = vmatmul.mubr.msk.bf16.gmra.mrb[20].mxu0 %vm312_vm1, %v1154_v38  ;;  %2290 = vrcp.f32 %v946_v24  ;;  %v1181_v12 = vmul.f32 %v2320_v17, %v1101_v53  ;;  %v1133_v60 = vmul.f32 %v2320_v17, %v1069_v35  ;;  %v2328_v35 = vld [vmem:[%s2403_s10 + $0xd0] sm:$0xff] }
 0x1ab   : > { %2292 = vpow2.f32 %v1900_v4 }
 0x1ac   : > { %2294 = vrcp.f32 %v947_v49 }
 0x1ad   : > { %2296 = vpow2.f32 %v1901_v34 }
 0x1ae   : > { %2298 = vpow2.f32 %v1902_v48 }
 0x1af   : > { %2300 = vrcp.f32 %v951_v23 }
 0x1b0   : > { %v2283_v52 = vpop.eup %2282  ;;  %2302 = vrcp.f32 %v952_v16 }
 0x1b1   : > { %v2285_v36 = vpop.eup %2284  ;;  %vm1038_vm8 = vcmp.gt.f32.partialorder %v2283_v52, 0.5 }
 0x1b2   : > { %v2287_v19 = vpop.eup %2286  ;;  %v1102_v15 = vsel %vm1038_vm8, 0.0, %v2283_v52  ;;  %v1070_v13 = vsel %vm1038_vm8, 1.0, %v2283_v52  ;;  %vm1039_vm9 = vcmp.gt.f32.partialorder %v2285_v36, 0.5 }
 0x1b3   : > { %v2289_v26 = vpop.eup %2288  ;;  %v1182_v1 = vmul.f32 %v2321_v59, %v1102_v15  ;;  %v1134_v57 = vmul.f32 %v2321_v59, %v1070_v13  ;;  %vm1040_vm10 = vcmp.gt.f32.partialorder %v2287_v19, 0.5  ;;  %v1103_v27 = vsel %vm1039_vm9, 0.0, %v2285_v36 }
 0x1b4   : > { %v2291_v54 = vpop.eup %2290  ;;  %v1104_v47 = vsel %vm1040_vm10, 0.0, %v2287_v19  ;;  %v1183_v18 = vmul.f32 %v2322_v11, %v1103_v27  ;;  %v1071_v43 = vsel %vm1039_vm9, 1.0, %v2285_v36  ;;  %v1072_v5 = vsel %vm1040_vm10, 1.0, %v2287_v19  ;;  %v2329_v19 = vld [vmem:[%s2403_s10 + $0xd8] sm:$0xff] }
 0x1b5   : > { %v2293_v25 = vpop.eup %2292  ;;  %v1203_v50 = vpack.c.bf16 %v1182_v1, %v1181_v12  ;;  %v1155_v21 = vpack.c.bf16 %v1134_v57, %v1133_v60  ;;  %v1184_v40 = vmul.f32 %v2323_v56, %v1104_v47  ;;  %v1135_v55 = vmul.f32 %v2322_v11, %v1071_v43  ;;  %v2331_v43 = vld [vmem:[%s2403_s10 + $0xe8] sm:$0xff] }
 0x1b6   : > { %v2295_v33 = vpop.eup %2294  ;;  %v1136_v22 = vmul.f32 %v2323_v56, %v1072_v5  ;;  %vm1041_vm11 = vcmp.gt.f32.partialorder %v2289_v26, 0.5  ;;  %vm1042_vm12 = vcmp.gt.f32.partialorder %v2291_v54, 0.5  ;;  %v948_v42 = vadd.f32 1.0, %v2293_v25 }
 0x1b7   : > { %v2297_v31 = vpop.eup %2296  ;;  %2083 = vmatprep.mubr.msk.bf16.mxu1 %vm312_vm1, %v1203_v50  ;;  %2117 = vmatprep.mubr.msk.bf16.mxu0 %vm312_vm1, %v1155_v21  ;;  %v1204_v6 = vpack.c.bf16 %v1184_v40, %v1183_v18  ;;  %v1105_v63 = vsel %vm1041_vm11, 0.0, %v2289_v26  ;;  %v1106_v37 = vsel %vm1042_vm12, 0.0, %v2291_v54  ;;  %v1073_v44 = vsel %vm1041_vm11, 1.0, %v2289_v26 }
 0x1b8   : > { %v2299_v20 = vpop.eup %2298  ;;  %v1156_v9 = vpack.c.bf16 %v1136_v22, %v1135_v55  ;;  %v1185_v10 = vmul.f32 %v2324_v51, %v1105_v63  ;;  %v1186_v41 = vmul.f32 %v2325_v61, %v1106_v37  ;;  %v1074_v29 = vsel %vm1042_vm12, 1.0, %v2291_v54  ;;  %v2330_v54 = vld [vmem:[%s2403_s10 + $0xe0] sm:$0xff] }
 0x1b9   : > { %v2301_v62 = vpop.eup %2300  ;;  %2084 = vmatmul.mubr.msk.bf16.gmra.mrb[24].mxu1 %vm312_vm1, %v1204_v6  ;;  %v1137_v46 = vmul.f32 %v2324_v51, %v1073_v44  ;;  %v1138_v30 = vmul.f32 %v2325_v61, %v1074_v29  ;;  %2304 = vrcp.f32 %v948_v42  ;;  %v949_v2 = vadd.f32 1.0, %v2297_v31 }
 0x1ba   : > { %v2303_v3 = vpop.eup %2302  ;;  %2118 = vmatmul.mubr.msk.bf16.gmra.mrb[24].mxu0 %vm312_vm1, %v1156_v9  ;;  %v1205_v0 = vpack.c.bf16 %v1186_v41, %v1185_v10  ;;  %v950_v32 = vadd.f32 1.0, %v2299_v20  ;;  %vm1043_vm13 = vcmp.gt.f32.partialorder %v2295_v33, 0.5  ;;  %vm1047_vm14 = vcmp.gt.f32.partialorder %v2301_v62, 0.5 }
 0x1bb   : > { %v1157_v7 = vpack.c.bf16 %v1138_v30, %v1137_v46  ;;  %2306 = vrcp.f32 %v949_v2  ;;  %vm1048_vm15 = vcmp.gt.f32.partialorder %v2303_v3, 0.5  ;;  %v1111_v8 = vsel %vm1047_vm14, 0.0, %v2301_v62 }
 0x1bc   : > { %2087 = vmatprep.mubr.msk.bf16.mxu1 %vm312_vm1, %v1205_v0  ;;  %2308 = vrcp.f32 %v950_v32  ;;  %v1112_v45 = vsel %vm1048_vm15, 0.0, %v2303_v3  ;;  %v1079_v39 = vsel %vm1047_vm14, 1.0, %v2301_v62  ;;  %v1191_v14 = vmul.f32 %v2326_v28, %v1111_v8 }
 0x1bd   : > { %2121 = vmatprep.mubr.msk.bf16.mxu0 %vm312_vm1, %v1157_v7  ;;  %v1192_v38 = vmul.f32 %v2327_v58, %v1112_v45  ;;  %v1080_v24 = vsel %vm1048_vm15, 1.0, %v2303_v3  ;;  %v1143_v4 = vmul.f32 %v2326_v28, %v1079_v39  ;;  %v1107_v48 = vsel %vm1043_vm13, 0.0, %v2295_v33 }
 0x1be   : > { %v1144_v49 = vmul.f32 %v2327_v58, %v1080_v24  ;;  %v1075_v23 = vsel %vm1043_vm13, 1.0, %v2295_v33  ;;  %v1187_v52 = vmul.f32 %v2328_v35, %v1107_v48 }
 0x1bf   : > { %v1208_v34 = vpack.c.bf16 %v1192_v38, %v1191_v14  ;;  %v1139_v36 = vmul.f32 %v2328_v35, %v1075_v23 }
 0x1c0   : > { %v1160_v16 = vpack.c.bf16 %v1144_v49, %v1143_v4 }
 0x1c3   : > { %v2305_v53 = vpop.eup %2304 }
 0x1c4   : > { %vm1044_vm0 = vcmp.gt.f32.partialorder %v2305_v53, 0.5 }
 0x1c5   : > { %v1108_v17 = vsel %vm1044_vm0, 0.0, %v2305_v53  ;;  %v1076_v12 = vsel %vm1044_vm0, 1.0, %v2305_v53  ;;  %v2307_v60 = vpop.eup %2306 }
 0x1c6   : > { %v1188_v15 = vmul.f32 %v2329_v19, %v1108_v17  ;;  %v1140_v13 = vmul.f32 %v2329_v19, %v1076_v12  ;;  %v2309_v26 = vpop.eup %2308  ;;  %vm1045_vm2 = vcmp.gt.f32.partialorder %v2307_v60, 0.5 }
 0x1c7   : > { %vm1046_vm3 = vcmp.gt.f32.partialorder %v2309_v26, 0.5  ;;  %v1109_v57 = vsel %vm1045_vm2, 0.0, %v2307_v60  ;;  %v1077_v11 = vsel %vm1045_vm2, 1.0, %v2307_v60 }
 0x1c8   : > { %v1206_v59 = vpack.c.bf16 %v1188_v15, %v1187_v52  ;;  %v1158_v1 = vpack.c.bf16 %v1140_v13, %v1139_v36  ;;  %v1110_v27 = vsel %vm1046_vm3, 0.0, %v2309_v26  ;;  %v1189_v47 = vmul.f32 %v2330_v54, %v1109_v57 }
 0x1c9   : > { %v1078_v18 = vsel %vm1046_vm3, 1.0, %v2309_v26  ;;  %v1190_v5 = vmul.f32 %v2331_v43, %v1110_v27  ;;  %v1141_v25 = vmul.f32 %v2330_v54, %v1077_v11 }
 0x1ca   : > { %2088 = vmatmul.mubr.msk.bf16.gmra.mrb[28].mxu1 %vm312_vm1, %v1206_v59  ;;  %2122 = vmatmul.mubr.msk.bf16.gmra.mrb[28].mxu0 %vm312_vm1, %v1158_v1  ;;  %v1142_v50 = vmul.f32 %v2331_v43, %v1078_v18 }
 0x1cb   : > { %v1207_v21 = vpack.c.bf16 %v1190_v5, %v1189_v47 }
 0x1cc   : > { %v1159_v56 = vpack.c.bf16 %v1142_v50, %v1141_v25 }
 0x1cd   : > { %2091 = vmatprep.mubr.msk.bf16.mxu1 %vm312_vm1, %v1207_v21 }
 0x1ce   : > { %2125 = vmatprep.mubr.msk.bf16.mxu0 %vm312_vm1, %v1159_v56 }
 0x1d2   : > { %2092 = vmatmul.mubr.msk.bf16.gmra.mrb[32].mxu1 %vm312_vm1, %v1208_v34  ;;  %2126 = vmatmul.mubr.msk.bf16.gmra.mrb[32].mxu0 %vm312_vm1, %v1160_v16 }
 0x24c   : > { %v2065_v40 = vpop.f32.mrb[4].mxu1 }
 0x24d   : > { %v2099_v55 = vpop.f32.mrb[4].mxu0  ;;  %v1301_v33 = vpop.f32.mrb[5].mxu1 }
 0x24e   : > { %v1525_v22 = vadd.f32 %v2099_v55, %v2065_v40  ;;  %v1516_v42 = vpop.f32.mrb[5].mxu0  ;;  %v2066_v31 = vpop.f32.mrb[6].mxu1 }
 0x24f   : > { %v1517_v6 = vadd.f32 %v1516_v42, %v1301_v33  ;;  %v2100_v63 = vpop.f32.mrb[6].mxu0  ;;  %v1304_v37 = vpop.f32.mrb[7].mxu1 }
 0x250   : > { %v1977_v44 = vpack.c.bf16 %v1525_v22, %v1525_v22  ;;  %v1528_v20 = vadd.f32 %v2100_v63, %v2066_v31  ;;  %v1519_v9 = vpop.f32.mrb[7].mxu0 }
 0x251   : > { %v1975_v51 = vpack.c.bf16 %v1517_v6, %v1517_v6  ;;  %v1520_v10 = vadd.f32 %v1519_v9, %v1304_v37 }
 0x252   : > { %1774 = vst.msk [vmem:[%s3070_s26 + $0x8] sm:$0xf] %vm1771_vm4, %v1977_v44  ;;  %v1978_v61 = vpack.c.bf16 %v1528_v20, %v1528_v20 }
 0x253   : > { %1772 = vst.msk [vmem:[%s3070_s26] sm:$0xf] %vm1771_vm4, %v1975_v51  ;;  %v1976_v41 = vpack.c.bf16 %v1520_v10, %v1520_v10 }
 0x254   : > { %1775 = vst.msk [vmem:[%s3070_s26 + $0xc] sm:$0xf] %vm1771_vm4, %v1978_v61  ;;  %v2069_v29 = vpop.f32.mrb[8].mxu1 }
 0x255   : > { %1773 = vst.msk [vmem:[%s3070_s26 + $0x4] sm:$0xf] %vm1771_vm4, %v1976_v41  ;;  %v2103_v62 = vpop.f32.mrb[8].mxu0  ;;  %v1317_v46 = vpop.f32.mrb[9].mxu1 }
 0x256   : > { %v1541_v30 = vadd.f32 %v2103_v62, %v2069_v29  ;;  %v1532_v3 = vpop.f32.mrb[9].mxu0  ;;  %v2070_v0 = vpop.f32.mrb[10].mxu1 }
 0x257   : > { %v1533_v2 = vadd.f32 %v1532_v3, %v1317_v46  ;;  %v2104_v7 = vpop.f32.mrb[10].mxu0  ;;  %v1320_v32 = vpop.f32.mrb[11].mxu1 }
 0x258   : > { %v1981_v8 = vpack.c.bf16 %v1541_v30, %v1541_v30  ;;  %v1544_v45 = vadd.f32 %v2104_v7, %v2070_v0  ;;  %v1535_v39 = vpop.f32.mrb[11].mxu0 }
 0x259   : > { %v1979_v28 = vpack.c.bf16 %v1533_v2, %v1533_v2  ;;  %v1536_v14 = vadd.f32 %v1535_v39, %v1320_v32 }
 0x25a   : > { %1778 = vst.msk [vmem:[%s3070_s26 + $0x18] sm:$0xf] %vm1771_vm4, %v1981_v8  ;;  %v1982_v58 = vpack.c.bf16 %v1544_v45, %v1544_v45 }
 0x25b   : > { %1776 = vst.msk [vmem:[%s3070_s26 + $0x10] sm:$0xf] %vm1771_vm4, %v1979_v28  ;;  %v1980_v38 = vpack.c.bf16 %v1536_v14, %v1536_v14 }
 0x25c   : > { %1779 = vst.msk [vmem:[%s3070_s26 + $0x1c] sm:$0xf] %vm1771_vm4, %v1982_v58 }
 0x25d   : > { %1777 = vst.msk [vmem:[%s3070_s26 + $0x14] sm:$0xf] %vm1771_vm4, %v1980_v38 }
 0x264   : > { %v2073_v24 = vpop.f32.mrb[12].mxu1  ;;  %v2107_v4 = vpop.f32.mrb[12].mxu0 }
 0x265   : > { %v1557_v49 = vadd.f32 %v2107_v4, %v2073_v24  ;;  %v1333_v34 = vpop.f32.mrb[13].mxu1  ;;  %v1548_v48 = vpop.f32.mrb[13].mxu0 }
 0x266   : > { %v1549_v23 = vadd.f32 %v1548_v48, %v1333_v34  ;;  %v2074_v16 = vpop.f32.mrb[14].mxu1  ;;  %v2108_v53 = vpop.f32.mrb[14].mxu0 }
 0x267   : > { %v1985_v35 = vpack.c.bf16 %v1557_v49, %v1557_v49  ;;  %v1560_v52 = vadd.f32 %v2108_v53, %v2074_v16  ;;  %v1336_v36 = vpop.f32.mrb[15].mxu1  ;;  %v1551_v17 = vpop.f32.mrb[15].mxu0 }
 0x268   : > { %v1983_v12 = vpack.c.bf16 %v1549_v23, %v1549_v23  ;;  %v1552_v60 = vadd.f32 %v1551_v17, %v1336_v36 }
 0x269   : > { %1782 = vst.msk [vmem:[%s3070_s26 + $0x28] sm:$0xf] %vm1771_vm4, %v1985_v35  ;;  %v1986_v19 = vpack.c.bf16 %v1560_v52, %v1560_v52 }
 0x26a   : > { %1780 = vst.msk [vmem:[%s3070_s26 + $0x20] sm:$0xf] %vm1771_vm4, %v1983_v12  ;;  %v1984_v15 = vpack.c.bf16 %v1552_v60, %v1552_v60 }
 0x26b   : > { %1783 = vst.msk [vmem:[%s3070_s26 + $0x2c] sm:$0xf] %vm1771_vm4, %v1986_v19 }
 0x26c   : > { %1781 = vst.msk [vmem:[%s3070_s26 + $0x24] sm:$0xf] %vm1771_vm4, %v1984_v15 }
 0x275   : > { %v2077_v13 = vpop.f32.mrb[16].mxu1  ;;  %v2111_v26 = vpop.f32.mrb[16].mxu0 }
 0x276   : > { %v1573_v59 = vadd.f32 %v2111_v26, %v2077_v13  ;;  %v1349_v1 = vpop.f32.mrb[17].mxu1  ;;  %v1564_v57 = vpop.f32.mrb[17].mxu0 }
 0x277   : > { %v1565_v27 = vadd.f32 %v1564_v57, %v1349_v1  ;;  %v2078_v54 = vpop.f32.mrb[18].mxu1  ;;  %v2112_v47 = vpop.f32.mrb[18].mxu0 }
 0x278   : > { %v1989_v11 = vpack.c.bf16 %v1573_v59, %v1573_v59  ;;  %v1576_v18 = vadd.f32 %v2112_v47, %v2078_v54  ;;  %v1352_v43 = vpop.f32.mrb[19].mxu1  ;;  %v1567_v5 = vpop.f32.mrb[19].mxu0 }
 0x279   : > { %v1987_v25 = vpack.c.bf16 %v1565_v27, %v1565_v27  ;;  %v1568_v50 = vadd.f32 %v1567_v5, %v1352_v43 }
 0x27a   : > { %1786 = vst.msk [vmem:[%s3070_s26 + $0x38] sm:$0xf] %vm1771_vm4, %v1989_v11  ;;  %v1990_v21 = vpack.c.bf16 %v1576_v18, %v1576_v18 }
 0x27b   : > { %1784 = vst.msk [vmem:[%s3070_s26 + $0x30] sm:$0xf] %vm1771_vm4, %v1987_v25  ;;  %v1988_v56 = vpack.c.bf16 %v1568_v50, %v1568_v50 }
 0x27c   : > { %1787 = vst.msk [vmem:[%s3070_s26 + $0x3c] sm:$0xf] %vm1771_vm4, %v1990_v21 }
 0x27d   : > { %1785 = vst.msk [vmem:[%s3070_s26 + $0x34] sm:$0xf] %vm1771_vm4, %v1988_v56  ;;  %v2081_v40 = vpop.f32.mrb[20].mxu1  ;;  %v2115_v55 = vpop.f32.mrb[20].mxu0 }
 0x27e   : > { %v1589_v33 = vadd.f32 %v2115_v55, %v2081_v40  ;;  %v1365_v22 = vpop.f32.mrb[21].mxu1  ;;  %v1580_v42 = vpop.f32.mrb[21].mxu0 }
 0x27f   : > { %v1581_v31 = vadd.f32 %v1580_v42, %v1365_v22  ;;  %v2082_v6 = vpop.f32.mrb[22].mxu1  ;;  %v2116_v63 = vpop.f32.mrb[22].mxu0 }
 0x280   : > { %v1993_v37 = vpack.c.bf16 %v1589_v33, %v1589_v33  ;;  %v1592_v44 = vadd.f32 %v2116_v63, %v2082_v6  ;;  %v1368_v20 = vpop.f32.mrb[23].mxu1  ;;  %v1583_v9 = vpop.f32.mrb[23].mxu0 }
 0x281   : > { %v1991_v51 = vpack.c.bf16 %v1581_v31, %v1581_v31  ;;  %v1584_v10 = vadd.f32 %v1583_v9, %v1368_v20 }
 0x282   : > { %1790 = vst.msk [vmem:[%s3070_s26 + $0x48] sm:$0xf] %vm1771_vm4, %v1993_v37  ;;  %v1994_v61 = vpack.c.bf16 %v1592_v44, %v1592_v44 }
 0x283   : > { %1788 = vst.msk [vmem:[%s3070_s26 + $0x40] sm:$0xf] %vm1771_vm4, %v1991_v51  ;;  %v1992_v41 = vpack.c.bf16 %v1584_v10, %v1584_v10 }
 0x284   : > { %1791 = vst.msk [vmem:[%s3070_s26 + $0x4c] sm:$0xf] %vm1771_vm4, %v1994_v61 }
 0x285   : > { %1789 = vst.msk [vmem:[%s3070_s26 + $0x44] sm:$0xf] %vm1771_vm4, %v1992_v41 }
 0x28c   : > { %v2085_v29 = vpop.f32.mrb[24].mxu1 }
 0x28d   : > { %v2119_v62 = vpop.f32.mrb[24].mxu0  ;;  %v1381_v46 = vpop.f32.mrb[25].mxu1 }
 0x28e   : > { %v1605_v30 = vadd.f32 %v2119_v62, %v2085_v29  ;;  %v1596_v3 = vpop.f32.mrb[25].mxu0  ;;  %v2086_v0 = vpop.f32.mrb[26].mxu1 }
 0x28f   : > { %v1597_v2 = vadd.f32 %v1596_v3, %v1381_v46  ;;  %v2120_v7 = vpop.f32.mrb[26].mxu0  ;;  %v1384_v32 = vpop.f32.mrb[27].mxu1 }
 0x290   : > { %v1997_v8 = vpack.c.bf16 %v1605_v30, %v1605_v30  ;;  %v1608_v45 = vadd.f32 %v2120_v7, %v2086_v0  ;;  %v1599_v39 = vpop.f32.mrb[27].mxu0 }
 0x291   : > { %v1995_v28 = vpack.c.bf16 %v1597_v2, %v1597_v2  ;;  %v1600_v14 = vadd.f32 %v1599_v39, %v1384_v32 }
 0x292   : > { %1794 = vst.msk [vmem:[%s3070_s26 + $0x58] sm:$0xf] %vm1771_vm4, %v1997_v8  ;;  %v1998_v58 = vpack.c.bf16 %v1608_v45, %v1608_v45 }
 0x293   : > { %1792 = vst.msk [vmem:[%s3070_s26 + $0x50] sm:$0xf] %vm1771_vm4, %v1995_v28  ;;  %v1996_v38 = vpack.c.bf16 %v1600_v14, %v1600_v14 }
 0x294   : > { %1795 = vst.msk [vmem:[%s3070_s26 + $0x5c] sm:$0xf] %vm1771_vm4, %v1998_v58 }
 0x295   : > { %1793 = vst.msk [vmem:[%s3070_s26 + $0x54] sm:$0xf] %vm1771_vm4, %v1996_v38 }
 0x29d   : > { %v2089_v24 = vpop.f32.mrb[28].mxu1  ;;  %v2123_v4 = vpop.f32.mrb[28].mxu0 }
 0x29e   : > { %v1621_v49 = vadd.f32 %v2123_v4, %v2089_v24  ;;  %v1397_v34 = vpop.f32.mrb[29].mxu1  ;;  %v1612_v48 = vpop.f32.mrb[29].mxu0 }
 0x29f   : > { %v1613_v23 = vadd.f32 %v1612_v48, %v1397_v34  ;;  %v2090_v16 = vpop.f32.mrb[30].mxu1  ;;  %v2124_v53 = vpop.f32.mrb[30].mxu0 }
 0x2a0   : > { %v2001_v35 = vpack.c.bf16 %v1621_v49, %v1621_v49  ;;  %v1624_v52 = vadd.f32 %v2124_v53, %v2090_v16  ;;  %v1400_v36 = vpop.f32.mrb[31].mxu1  ;;  %v1615_v17 = vpop.f32.mrb[31].mxu0 }
 0x2a1   : > { %v1999_v12 = vpack.c.bf16 %v1613_v23, %v1613_v23  ;;  %v1616_v60 = vadd.f32 %v1615_v17, %v1400_v36 }
 0x2a2   : > { %1798 = vst.msk [vmem:[%s3070_s26 + $0x68] sm:$0xf] %vm1771_vm4, %v2001_v35  ;;  %v2002_v19 = vpack.c.bf16 %v1624_v52, %v1624_v52 }
 0x2a3   : > { %1796 = vst.msk [vmem:[%s3070_s26 + $0x60] sm:$0xf] %vm1771_vm4, %v1999_v12  ;;  %v2000_v15 = vpack.c.bf16 %v1616_v60, %v1616_v60 }
 0x2a4   : > { %1799 = vst.msk [vmem:[%s3070_s26 + $0x6c] sm:$0xf] %vm1771_vm4, %v2002_v19 }
 0x2a5   : > { %1797 = vst.msk [vmem:[%s3070_s26 + $0x64] sm:$0xf] %vm1771_vm4, %v2000_v15  ;;  %v2093_v13 = vpop.f32.mrb[32].mxu1  ;;  %v2127_v26 = vpop.f32.mrb[32].mxu0 }
 0x2a6   : > { %v1637_v59 = vadd.f32 %v2127_v26, %v2093_v13  ;;  %v1413_v1 = vpop.f32.mrb[33].mxu1  ;;  %v1628_v57 = vpop.f32.mrb[33].mxu0 }
 0x2a7   : > { %v1629_v27 = vadd.f32 %v1628_v57, %v1413_v1  ;;  %v2094_v54 = vpop.f32.mrb[34].mxu1  ;;  %v2128_v47 = vpop.f32.mrb[34].mxu0 }
 0x2a8   : > { %v2005_v11 = vpack.c.bf16 %v1637_v59, %v1637_v59  ;;  %v1640_v18 = vadd.f32 %v2128_v47, %v2094_v54  ;;  %v1416_v43 = vpop.f32.mrb[35].mxu1  ;;  %v1631_v5 = vpop.f32.mrb[35].mxu0 }
 0x2a9   : > { %v2003_v25 = vpack.c.bf16 %v1629_v27, %v1629_v27  ;;  %v1632_v50 = vadd.f32 %v1631_v5, %v1416_v43 }
 0x2aa   : > { %1802 = vst.msk [vmem:[%s3070_s26 + $0x78] sm:$0xf] %vm1771_vm4, %v2005_v11  ;;  %v2006_v21 = vpack.c.bf16 %v1640_v18, %v1640_v18 }
 0x2ab   : > { %1800 = vst.msk [vmem:[%s3070_s26 + $0x70] sm:$0xf] %vm1771_vm4, %v2003_v25  ;;  %v2004_v56 = vpack.c.bf16 %v1632_v50, %v1632_v50 }
 0x2ac   : > { %1803 = vst.msk [vmem:[%s3070_s26 + $0x7c] sm:$0xf] %vm1771_vm4, %v2006_v21 }
 0x2ad   : > { %1801 = vst.msk [vmem:[%s3070_s26 + $0x74] sm:$0xf] %vm1771_vm4, %v2004_v56 }
 0x2ae PF: > { %s17_s24 = sadd.s32 1, %s2338_s24  }
 0x2af   : > { %p14_p4 = scmp.ge.s32.totalorder %s17_s24, 4  }
 0x2b1   :  { %16 = sbr.rel (!%p14_p4) target bundleno = 1 (0x1), region = 78 }

// kernel: scconv_forward.4
= control target key start
LH: loop header
LB: loop body
LE: loop exit
PB: predicated region body
PF: predicated region fallthrough
CT: control target
= control target key end

     0   :  { %s1180_s12 = smov 0   ;;  %s1182_s13 = smov 0   ;;  %s1330_s0 = inlined_call_operand.vmem [shape: bf16[512,128], index: 0, kind: input, shape index: {}]   ;;  %s1331_s1 = inlined_call_operand.vmem [shape: bf16[128,128], index: 1, kind: input, shape index: {}]   ;;  %s1332_s2 = inlined_call_operand.vmem [shape: f32[1,128], index: 2, kind: input, shape index: {}]   ;;  %s1333_s3 = inlined_call_operand.vmem [shape: f32[512,128], index: 3, kind: output, shape index: {}]  }
   0x1   :  { %s1184_s14 = smov 0  }
   0x2 LB: > { %s32_s15 = sadd.s32 1, %s1154_s13  ;;  %p968_p0 = scmp.ge.s32.totalorder %s1158_s14, 1  ;;  %s1158_s14 = sphi %s1184_s14, %s13_s14   ;;  %s1154_s13 = sphi %s1182_s13, %s1335_s13   ;;  %s1150_s12 = sphi %s1180_s12, %s1334_s12  }
   0x3   : > { %p34_p1 = scmp.ge.s32.totalorder %s32_s15, 2  ;;  %p188_p2 = scmp.lt.s32.totalorder %s1158_s14, 3 }
   0x5   : > { %s1337_s15 = smov (%p34_p1, %s32_s15), 0  ;;  %p189_p3 = pnand %p968_p0, %p188_p2 }
   0x6   : > { %v1112_v0 = vld [vmem:[%s1331_s1] sm:$0xff] (!%p189_p3)   ;;  %s969_s18 = sshll.u32 (!%p189_p3), %s1150_s12, 5  ;;  %v1113_v1 = vld [vmem:[%s1331_s1 + $0x8] sm:$0xff] (!%p189_p3)   ;;  %v1114_v2 = vld [vmem:[%s1331_s1 + $0x10] sm:$0xff] (!%p189_p3)  }
   0x7   : > { %192 = sbr.rel (%p189_p3) target bundleno = 281 (0x119), region = 32  ;;  %p230_p4 = scmp.lt.s32.totalorder (!%p189_p3), %s969_s18, 63  ;;  %1024 = vmatprep.subr.bf16.mxu0 (!%p189_p3), %v1112_v0  ;;  %1072 = vmatprep.subr.bf16.mxu1 (!%p189_p3), %v1112_v0  ;;  %v1115_v3 = vld [vmem:[%s1331_s1 + $0x18] sm:$0xff] (!%p189_p3)   ;;  %v1116_v6 = vld [vmem:[%s1331_s1 + $0x20] sm:$0xff] (!%p189_p3)   ;;  %v1117_v7 = vld [vmem:[%s1331_s1 + $0x28] sm:$0xff] (!%p189_p3)  }
   0x8   : > { %1025 = vmatpush3.bf16.msra.mxu0 (!%p189_p3), %v1112_v0  ;;  %1080 = vmatpush3.bf16.msra.mxu1 (!%p189_p3), %v1112_v0  ;;  %v1118_v8 = vld [vmem:[%s1331_s1 + $0x30] sm:$0xff] (!%p189_p3)   ;;  %v1119_v9 = vld [vmem:[%s1331_s1 + $0x38] sm:$0xff] (!%p189_p3)   ;;  %v1250_v24 = vld [vmem:[%s1332_s2] ss:$0 sm:$0xff] (!%p189_p3) }
   0x9   : > { %1026 = vmatprep.subr.bf16.mxu0 (!%p189_p3), %v1113_v1  ;;  %1073 = vmatprep.subr.bf16.mxu1 (!%p189_p3), %v1113_v1 }
   0xc   : > { %1027 = vmatpush3.bf16.msra.mxu0 (!%p189_p3), %v1113_v1  ;;  %1081 = vmatpush3.bf16.msra.mxu1 (!%p189_p3), %v1113_v1 }
   0xd   : > { %1028 = vmatprep.subr.bf16.mxu0 (!%p189_p3), %v1114_v2  ;;  %1074 = vmatprep.subr.bf16.mxu1 (!%p189_p3), %v1114_v2 }
   0xe   : > { %s1339_s18 = smov (!%p230_p4, %s969_s18), 63 }
   0xf   : > { %s970_s23 = sshll.u32 %s1339_s18, 2  ;;  %s972_s10 = sshll.u32 %s1339_s18, 3 }
  0x10   : > { %s1213_s26 = scalar_lea.vmem %s1330_s0, %s970_s23  ;;  %1029 = vmatpush3.bf16.msra.mxu0 %v1114_v2  ;;  %1082 = vmatpush3.bf16.msra.mxu1 %v1114_v2  ;;  %s1255_s19 = scalar_lea.vmem %s1333_s3, %s972_s10 }
  0x11   : > { %v1120_v4 = vld [vmem:[%s1213_s26] sm:$0xff]   ;;  %1030 = vmatprep.subr.bf16.mxu0 %v1115_v3  ;;  %1075 = vmatprep.subr.bf16.mxu1 %v1115_v3  ;;  %v1122_v10 = vld [vmem:[%s1213_s26 + $0x8] sm:$0xff]   ;;  %v1124_v12 = vld [vmem:[%s1213_s26 + $0x10] sm:$0xff]  }
  0x12   : > { %v1121_v5 = vld [vmem:[%s1213_s26 + $0x40] sm:$0xff]   ;;  %1040 = vmatprep.mubr.bf16.mxu0 %v1120_v4  ;;  %v1123_v11 = vld [vmem:[%s1213_s26 + $0x48] sm:$0xff]   ;;  %v1125_v13 = vld [vmem:[%s1213_s26 + $0x50] sm:$0xff]  }
  0x13   : > { %1056 = vmatprep.mubr.bf16.mxu1 %v1121_v5  ;;  %v1126_v14 = vld [vmem:[%s1213_s26 + $0x18] sm:$0xff]   ;;  %v1128_v16 = vld [vmem:[%s1213_s26 + $0x20] sm:$0xff]   ;;  %v1130_v18 = vld [vmem:[%s1213_s26 + $0x28] sm:$0xff]  }
  0x14   : > { %1031 = vmatpush3.bf16.msra.mxu0 %v1115_v3  ;;  %1083 = vmatpush3.bf16.msra.mxu1 %v1115_v3  ;;  %v1127_v15 = vld [vmem:[%s1213_s26 + $0x58] sm:$0xff]   ;;  %v1129_v17 = vld [vmem:[%s1213_s26 + $0x60] sm:$0xff]   ;;  %v1131_v19 = vld [vmem:[%s1213_s26 + $0x68] sm:$0xff]  }
  0x15   : > { %1032 = vmatprep.subr.bf16.mxu0 %v1116_v6  ;;  %1076 = vmatprep.subr.bf16.mxu1 %v1116_v6  ;;  %v1132_v20 = vld [vmem:[%s1213_s26 + $0x30] sm:$0xff]   ;;  %v1134_v22 = vld [vmem:[%s1213_s26 + $0x38] sm:$0xff]  }
  0x16   : > { %v1133_v21 = vld [vmem:[%s1213_s26 + $0x70] sm:$0xff]   ;;  %v1135_v23 = vld [vmem:[%s1213_s26 + $0x78] sm:$0xff]  }
  0x18   : > { %1033 = vmatpush3.bf16.msra.mxu0 %v1116_v6  ;;  %1084 = vmatpush3.bf16.msra.mxu1 %v1116_v6 }
  0x19   : > { %1034 = vmatprep.subr.bf16.mxu0 %v1117_v7  ;;  %1077 = vmatprep.subr.bf16.mxu1 %v1117_v7 }
  0x1c   : > { %1035 = vmatpush3.bf16.msra.mxu0 %v1117_v7  ;;  %1085 = vmatpush3.bf16.msra.mxu1 %v1117_v7 }
  0x1d   : > { %1036 = vmatprep.subr.bf16.mxu0 %v1118_v8  ;;  %1078 = vmatprep.subr.bf16.mxu1 %v1118_v8 }
  0x20   : > { %1037 = vmatpush3.bf16.msra.mxu0 %v1118_v8  ;;  %1086 = vmatpush3.bf16.msra.mxu1 %v1118_v8 }
  0x21   : > { %1038 = vmatprep.subr.bf16.mxu0 %v1119_v9  ;;  %1079 = vmatprep.subr.bf16.mxu1 %v1119_v9 }
  0x24   : > { %1039 = vmatpush3.bf16.msra.mxu0 %v1119_v9  ;;  %1087 = vmatpush3.bf16.msra.mxu1 %v1119_v9 }
  0x27   : > { %1041 = vmatmul.mubr.bf16.vlgmr.msra.gmra.mrb[0].mxu0 %v1122_v10  ;;  %1057 = vmatmul.mubr.bf16.vlgmr.msra.gmra.mrb[0].mxu1 %v1123_v11 }
  0x28   : > { %1044 = vmatprep.mubr.bf16.mxu0 %v1124_v12  ;;  %1060 = vmatprep.mubr.bf16.mxu1 %v1125_v13 }
  0x2f   : > { %1045 = vmatmul.mubr.bf16.gmra.mrb[4].mxu0 %v1126_v14  ;;  %1061 = vmatmul.mubr.bf16.gmra.mrb[4].mxu1 %v1127_v15 }
  0x30   : > { %1048 = vmatprep.mubr.bf16.mxu0 %v1128_v16  ;;  %1064 = vmatprep.mubr.bf16.mxu1 %v1129_v17 }
  0x37   : > { %1049 = vmatmul.mubr.bf16.gmra.mrb[8].mxu0 %v1130_v18  ;;  %1065 = vmatmul.mubr.bf16.gmra.mrb[8].mxu1 %v1131_v19 }
  0x38   : > { %1052 = vmatprep.mubr.bf16.mxu0 %v1132_v20  ;;  %1068 = vmatprep.mubr.bf16.mxu1 %v1133_v21 }
  0x3f   : > { %1053 = vmatmul.mubr.bf16.gmra.mrb[12].mxu0 %v1134_v22  ;;  %1069 = vmatmul.mubr.bf16.gmra.mrb[12].mxu1 %v1135_v23 }
  0xfa   : > { %v1042_v25 = vpop.f32.mrb[0].mxu0  ;;  %v1058_v26 = vpop.f32.mrb[0].mxu1 }
  0xfb   : > { %v789_v27 = vadd.f32 %v1042_v25, %v1250_v24  ;;  %v805_v28 = vadd.f32 %v1058_v26, %v1250_v24  ;;  %v554_v29 = vpop.f32.mrb[1].mxu0  ;;  %v618_v30 = vpop.f32.mrb[1].mxu1 }
  0xfc   : > { %v787_v31 = vadd.f32 %v1250_v24, %v554_v29  ;;  %v803_v32 = vadd.f32 %v1250_v24, %v618_v30  ;;  %v1043_v33 = vpop.f32.mrb[2].mxu0  ;;  %v1059_v34 = vpop.f32.mrb[2].mxu1 }
  0xfd   : > { %821 = vst [vmem:[%s1255_s19 + $0x10] sm:$0xff] %v789_v27  ;;  %837 = vst [vmem:[%s1255_s19 + $0x90] sm:$0xff] %v805_v28  ;;  %v790_v35 = vadd.f32 %v1043_v33, %v1250_v24  ;;  %v806_v36 = vadd.f32 %v1059_v34, %v1250_v24  ;;  %v557_v37 = vpop.f32.mrb[3].mxu0  ;;  %v621_v38 = vpop.f32.mrb[3].mxu1 }
  0xfe   : > { %819 = vst [vmem:[%s1255_s19] sm:$0xff] %v787_v31  ;;  %835 = vst [vmem:[%s1255_s19 + $0x80] sm:$0xff] %v803_v32  ;;  %v788_v39 = vadd.f32 %v1250_v24, %v557_v37  ;;  %v804_v40 = vadd.f32 %v1250_v24, %v621_v38 }
  0xff   : > { %822 = vst [vmem:[%s1255_s19 + $0x18] sm:$0xff] %v790_v35  ;;  %838 = vst [vmem:[%s1255_s19 + $0x98] sm:$0xff] %v806_v36 }
 0x100   : > { %820 = vst [vmem:[%s1255_s19 + $0x8] sm:$0xff] %v788_v39  ;;  %836 = vst [vmem:[%s1255_s19 + $0x88] sm:$0xff] %v804_v40 }
 0x102   : > { %v1046_v41 = vpop.f32.mrb[4].mxu0  ;;  %v1062_v42 = vpop.f32.mrb[4].mxu1 }
 0x103   : > { %v793_v43 = vadd.f32 %v1046_v41, %v1250_v24  ;;  %v809_v44 = vadd.f32 %v1062_v42, %v1250_v24  ;;  %v570_v45 = vpop.f32.mrb[5].mxu0  ;;  %v634_v46 = vpop.f32.mrb[5].mxu1 }
 0x104   : > { %v791_v47 = vadd.f32 %v1250_v24, %v570_v45  ;;  %v807_v48 = vadd.f32 %v1250_v24, %v634_v46  ;;  %v1047_v49 = vpop.f32.mrb[6].mxu0  ;;  %v1063_v50 = vpop.f32.mrb[6].mxu1 }
 0x105   : > { %825 = vst [vmem:[%s1255_s19 + $0x30] sm:$0xff] %v793_v43  ;;  %841 = vst [vmem:[%s1255_s19 + $0xb0] sm:$0xff] %v809_v44  ;;  %v794_v51 = vadd.f32 %v1047_v49, %v1250_v24  ;;  %v810_v52 = vadd.f32 %v1063_v50, %v1250_v24  ;;  %v573_v53 = vpop.f32.mrb[7].mxu0  ;;  %v637_v54 = vpop.f32.mrb[7].mxu1 }
 0x106   : > { %823 = vst [vmem:[%s1255_s19 + $0x20] sm:$0xff] %v791_v47  ;;  %839 = vst [vmem:[%s1255_s19 + $0xa0] sm:$0xff] %v807_v48  ;;  %v792_v55 = vadd.f32 %v1250_v24, %v573_v53  ;;  %v808_v56 = vadd.f32 %v1250_v24, %v637_v54 }
 0x107   : > { %826 = vst [vmem:[%s1255_s19 + $0x38] sm:$0xff] %v794_v51  ;;  %842 = vst [vmem:[%s1255_s19 + $0xb8] sm:$0xff] %v810_v52 }
 0x108   : > { %824 = vst [vmem:[%s1255_s19 + $0x28] sm:$0xff] %v792_v55  ;;  %840 = vst [vmem:[%s1255_s19 + $0xa8] sm:$0xff] %v808_v56 }
 0x10a   : > { %v1050_v57 = vpop.f32.mrb[8].mxu0  ;;  %v1066_v58 = vpop.f32.mrb[8].mxu1 }
 0x10b   : > { %v797_v59 = vadd.f32 %v1050_v57, %v1250_v24  ;;  %v813_v60 = vadd.f32 %v1066_v58, %v1250_v24  ;;  %v586_v61 = vpop.f32.mrb[9].mxu0  ;;  %v650_v62 = vpop.f32.mrb[9].mxu1 }
 0x10c   : > { %v795_v63 = vadd.f32 %v1250_v24, %v586_v61  ;;  %v811_v0 = vadd.f32 %v1250_v24, %v650_v62  ;;  %v1051_v1 = vpop.f32.mrb[10].mxu0  ;;  %v1067_v2 = vpop.f32.mrb[10].mxu1 }
 0x10d   : > { %829 = vst [vmem:[%s1255_s19 + $0x50] sm:$0xff] %v797_v59  ;;  %845 = vst [vmem:[%s1255_s19 + $0xd0] sm:$0xff] %v813_v60  ;;  %v798_v3 = vadd.f32 %v1051_v1, %v1250_v24  ;;  %v814_v4 = vadd.f32 %v1067_v2, %v1250_v24  ;;  %v589_v5 = vpop.f32.mrb[11].mxu0  ;;  %v653_v6 = vpop.f32.mrb[11].mxu1 }
 0x10e   : > { %827 = vst [vmem:[%s1255_s19 + $0x40] sm:$0xff] %v795_v63  ;;  %843 = vst [vmem:[%s1255_s19 + $0xc0] sm:$0xff] %v811_v0  ;;  %v796_v7 = vadd.f32 %v1250_v24, %v589_v5  ;;  %v812_v8 = vadd.f32 %v1250_v24, %v653_v6 }
 0x10f   : > { %830 = vst [vmem:[%s1255_s19 + $0x58] sm:$0xff] %v798_v3  ;;  %846 = vst [vmem:[%s1255_s19 + $0xd8] sm:$0xff] %v814_v4 }
 0x110   : > { %828 = vst [vmem:[%s1255_s19 + $0x48] sm:$0xff] %v796_v7  ;;  %844 = vst [vmem:[%s1255_s19 + $0xc8] sm:$0xff] %v812_v8 }
 0x112   : > { %v1054_v9 = vpop.f32.mrb[12].mxu0  ;;  %v1070_v10 = vpop.f32.mrb[12].mxu1 }
 0x113   : > { %v801_v11 = vadd.f32 %v1054_v9, %v1250_v24  ;;  %v817_v12 = vadd.f32 %v1070_v10, %v1250_v24  ;;  %v602_v13 = vpop.f32.mrb[13].mxu0  ;;  %v666_v14 = vpop.f32.mrb[13].mxu1 }
 0x114   : > { %v799_v15 = vadd.f32 %v1250_v24, %v602_v13  ;;  %v815_v16 = vadd.f32 %v1250_v24, %v666_v14  ;;  %v1055_v17 = vpop.f32.mrb[14].mxu0  ;;  %v1071_v18 = vpop.f32.mrb[14].mxu1 }
 0x115   : > { %833 = vst [vmem:[%s1255_s19 + $0x70] sm:$0xff] %v801_v11  ;;  %849 = vst [vmem:[%s1255_s19 + $0xf0] sm:$0xff] %v817_v12  ;;  %v802_v19 = vadd.f32 %v1055_v17, %v1250_v24  ;;  %v818_v20 = vadd.f32 %v1071_v18, %v1250_v24  ;;  %v605_v21 = vpop.f32.mrb[15].mxu0  ;;  %v669_v22 = vpop.f32.mrb[15].mxu1 }
 0x116   : > { %831 = vst [vmem:[%s1255_s19 + $0x60] sm:$0xff] %v799_v15  ;;  %847 = vst [vmem:[%s1255_s19 + $0xe0] sm:$0xff] %v815_v16  ;;  %v800_v23 = vadd.f32 %v1250_v24, %v605_v21  ;;  %v816_v25 = vadd.f32 %v1250_v24, %v669_v22 }
 0x117   : > { %834 = vst [vmem:[%s1255_s19 + $0x78] sm:$0xff] %v802_v19  ;;  %850 = vst [vmem:[%s1255_s19 + $0xf8] sm:$0xff] %v818_v20 }
 0x118   : > { %832 = vst [vmem:[%s1255_s19 + $0x68] sm:$0xff] %v800_v23  ;;  %848 = vst [vmem:[%s1255_s19 + $0xe8] sm:$0xff] %v816_v25 }
 0x119 PF: > { %s13_s14 = sadd.s32 1, %s1158_s14   ;;  %s1334_s12 = smov %s1154_s13 }
 0x11a   : > { %p10_p5 = scmp.ge.s32.totalorder %s13_s14, 4   ;;  %s1335_s13 = smov %s1337_s15 }
 0x11c   :  { %12 = sbr.rel (!%p10_p5) target bundleno = 2 (0x2), region = 76 }

// kernel: scconv_forward.5
= control target key start
LH: loop header
LB: loop body
LE: loop exit
PB: predicated region body
PF: predicated region fallthrough
CT: control target
= control target key end

     0   :  { %s887_s9 = smov 0   ;;  %s1217_s0 = inlined_call_operand.vmem [shape: f32[2,256,32], index: 0, kind: input, shape index: {}]   ;;  %s1218_s1 = inlined_call_operand.vmem [shape: f32[32,16], index: 1, kind: input, shape index: {}]   ;;  %s1219_s2 = inlined_call_operand.vmem [shape: f32[2,256,16], index: 2, kind: output, shape index: {}]  }
   0x1 LB: > { %s703_s10 = sadd.s32 4294967295, %s870_s9   ;;  %p707_p0 = scmp.ge.s32.totalorder %s870_s9, 1  ;;  %s870_s9 = sphi %s887_s9, %s12_s9  }
   0x2   : > { %p112_p1 = scmp.lt.s32.totalorder %s870_s9, 3 }
   0x4   : > { %p113_p2 = pnand %p707_p0, %p112_p1 }
   0x5   : > { %p134_p3 = scmp.lt.s32.totalorder (!%p113_p2), %s703_s10, 1  ;;  %vm176_vm0 = vcmask (!%p113_p2), 261120   ;;  %vm615_vm1 = vcmask (!%p113_p2), 130048  }
   0x6   : > { %116 = sbr.rel (%p113_p2) target bundleno = 653 (0x28d), region = 28 }
   0xd   : > { %s1221_s10 = smov (!%p134_p3, %s703_s10), 1 }
   0xe   : > { %s746_s11 = sshll.u32 %s1221_s10, 8 }
   0xf   : > { %s903_s14 = scalar_lea.vmem %s1217_s0, %s746_s11  ;;  %s1148_s25 = scalar_lea.vmem %s1219_s2, %s746_s11 }
  0x10   : > { %v906_v0 = vld [vmem:[%s903_s14] sm:$0xff]  ;;  %v909_v1 = vld [vmem:[%s903_s14 + $0x8] sm:$0xff]  ;;  %v912_v2 = vld [vmem:[%s903_s14 + $0x10] sm:$0xff] }
  0x11   : > { %v915_v3 = vld [vmem:[%s903_s14 + $0x18] sm:$0xff]  ;;  %v177_v4 = vsel %vm176_vm0, %v906_v0, 0.0  ;;  %v178_v5 = vsel %vm176_vm0, %v909_v1, 0.0  ;;  %v180_v6 = vsel %vm176_vm0, %v912_v2, 0.0  ;;  %v924_v7 = vld [vmem:[%s903_s14 + $0x20] sm:$0xff]  ;;  %v929_v10 = vld [vmem:[%s903_s14 + $0x28] sm:$0xff] }
  0x12   : > { %v179_v8 = vadd.f32 %v178_v5, %v177_v4  ;;  %v182_v9 = vsel %vm176_vm0, %v915_v3, 0.0  ;;  %v184_v12 = vsel %vm176_vm0, %v924_v7, 0.0  ;;  %v934_v13 = vld [vmem:[%s903_s14 + $0x30] sm:$0xff]  ;;  %v186_v15 = vsel %vm176_vm0, %v929_v10, 0.0  ;;  %v939_v16 = vld [vmem:[%s903_s14 + $0x38] sm:$0xff]  ;;  %v944_v19 = vld [vmem:[%s903_s14 + $0x40] sm:$0xff] }
  0x13   : > { %v188_v18 = vsel %vm176_vm0, %v934_v13, 0.0  ;;  %v190_v21 = vsel %vm176_vm0, %v939_v16, 0.0  ;;  %v949_v22 = vld [vmem:[%s903_s14 + $0x48] sm:$0xff]  ;;  %v192_v24 = vsel %vm176_vm0, %v944_v19, 0.0  ;;  %v954_v25 = vld [vmem:[%s903_s14 + $0x50] sm:$0xff]  ;;  %v959_v28 = vld [vmem:[%s903_s14 + $0x58] sm:$0xff] }
  0x14   : > { %v181_v11 = vadd.f32 %v180_v6, %v179_v8  ;;  %v194_v27 = vsel %vm176_vm0, %v949_v22, 0.0  ;;  %v196_v30 = vsel %vm176_vm0, %v954_v25, 0.0  ;;  %v964_v31 = vld [vmem:[%s903_s14 + $0x60] sm:$0xff]  ;;  %v198_v33 = vsel %vm176_vm0, %v959_v28, 0.0  ;;  %v969_v34 = vld [vmem:[%s903_s14 + $0x68] sm:$0xff]  ;;  %v974_v37 = vld [vmem:[%s903_s14 + $0x70] sm:$0xff] }
  0x15   : > { %v200_v36 = vsel %vm176_vm0, %v964_v31, 0.0  ;;  %v202_v39 = vsel %vm176_vm0, %v969_v34, 0.0  ;;  %v979_v40 = vld [vmem:[%s903_s14 + $0x78] sm:$0xff]  ;;  %v204_v42 = vsel %vm176_vm0, %v974_v37, 0.0  ;;  %v984_v43 = vld [vmem:[%s903_s14 + $0x80] sm:$0xff]  ;;  %v989_v46 = vld [vmem:[%s903_s14 + $0x88] sm:$0xff] }
  0x16   : > { %v183_v14 = vadd.f32 %v182_v9, %v181_v11  ;;  %v206_v45 = vsel %vm176_vm0, %v979_v40, 0.0  ;;  %v208_v48 = vsel %vm176_vm0, %v984_v43, 0.0  ;;  %v994_v49 = vld [vmem:[%s903_s14 + $0x90] sm:$0xff]  ;;  %v210_v51 = vsel %vm176_vm0, %v989_v46, 0.0  ;;  %v999_v52 = vld [vmem:[%s903_s14 + $0x98] sm:$0xff]  ;;  %v1004_v55 = vld [vmem:[%s903_s14 + $0xa0] sm:$0xff] }
  0x17   : > { %v212_v54 = vsel %vm176_vm0, %v994_v49, 0.0  ;;  %v214_v57 = vsel %vm176_vm0, %v999_v52, 0.0  ;;  %v1009_v58 = vld [vmem:[%s903_s14 + $0xa8] sm:$0xff]  ;;  %v216_v60 = vsel %vm176_vm0, %v1004_v55, 0.0  ;;  %v1014_v61 = vld [vmem:[%s903_s14 + $0xb0] sm:$0xff]  ;;  %v1019_v4 = vld [vmem:[%s903_s14 + $0xb8] sm:$0xff] }
  0x18   : > { %v185_v17 = vadd.f32 %v184_v12, %v183_v14  ;;  %v218_v63 = vsel %vm176_vm0, %v1009_v58, 0.0  ;;  %v220_v6 = vsel %vm176_vm0, %v1014_v61, 0.0  ;;  %v1024_v8 = vld [vmem:[%s903_s14 + $0xc0] sm:$0xff]  ;;  %v222_v11 = vsel %vm176_vm0, %v1019_v4, 0.0  ;;  %v1029_v12 = vld [vmem:[%s903_s14 + $0xc8] sm:$0xff] }
  0x1a   : > { %v187_v20 = vadd.f32 %v186_v15, %v185_v17  ;;  %v224_v15 = vsel %vm176_vm0, %v1024_v8, 0.0  ;;  %v1034_v17 = vld [vmem:[%s903_s14 + $0xd0] sm:$0xff] }
  0x1c   : > { %v189_v23 = vadd.f32 %v188_v18, %v187_v20  ;;  %v226_v20 = vsel %vm176_vm0, %v1029_v12, 0.0 }
  0x1e   : > { %v191_v26 = vadd.f32 %v190_v21, %v189_v23  ;;  %v1039_v21 = vld [vmem:[%s903_s14 + $0xd8] sm:$0xff] }
  0x20   : > { %v193_v29 = vadd.f32 %v192_v24, %v191_v26  ;;  %v228_v24 = vsel %vm176_vm0, %v1034_v17, 0.0  ;;  %v1044_v26 = vld [vmem:[%s903_s14 + $0xe0] sm:$0xff] }
  0x22   : > { %v195_v32 = vadd.f32 %v194_v27, %v193_v29  ;;  %v230_v29 = vsel %vm176_vm0, %v1039_v21, 0.0 }
  0x24   : > { %v197_v35 = vadd.f32 %v196_v30, %v195_v32  ;;  %v1049_v30 = vld [vmem:[%s903_s14 + $0xe8] sm:$0xff] }
  0x26   : > { %v199_v38 = vadd.f32 %v198_v33, %v197_v35  ;;  %v232_v33 = vsel %vm176_vm0, %v1044_v26, 0.0  ;;  %v1054_v35 = vld [vmem:[%s903_s14 + $0xf0] sm:$0xff] }
  0x28   : > { %v201_v41 = vadd.f32 %v200_v36, %v199_v38  ;;  %v234_v38 = vsel %vm176_vm0, %v1049_v30, 0.0 }
  0x2a   : > { %v203_v44 = vadd.f32 %v202_v39, %v201_v41  ;;  %v1059_v39 = vld [vmem:[%s903_s14 + $0xf8] sm:$0xff] }
  0x2c   : > { %v205_v47 = vadd.f32 %v204_v42, %v203_v44  ;;  %v236_v42 = vsel %vm176_vm0, %v1054_v35, 0.0 }
  0x2e   : > { %v207_v50 = vadd.f32 %v206_v45, %v205_v47  ;;  %v238_v45 = vsel %vm176_vm0, %v1059_v39, 0.0 }
  0x30   : > { %v209_v53 = vadd.f32 %v208_v48, %v207_v50 }
  0x32   : > { %v211_v56 = vadd.f32 %v210_v51, %v209_v53 }
  0x34   : > { %v213_v59 = vadd.f32 %v212_v54, %v211_v56 }
  0x36   : > { %v215_v62 = vadd.f32 %v214_v57, %v213_v59 }
  0x38   : > { %v217_v5 = vadd.f32 %v216_v60, %v215_v62 }
  0x3a   : > { %v219_v9 = vadd.f32 %v218_v63, %v217_v5 }
  0x3c   : > { %v221_v14 = vadd.f32 %v220_v6, %v219_v9 }
  0x3e   : > { %v223_v18 = vadd.f32 %v222_v11, %v221_v14  ;;  %v290_v11 = vld [vmem:[%s1218_s1] sm:$0xff]  ;;  %v291_v14 = vld [vmem:[%s1218_s1 + $0x8] sm:$0xff] }
  0x40   : > { %v225_v23 = vadd.f32 %v224_v15, %v223_v18  ;;  %v840_v15 = vpack.c.bf16 %v291_v14, %v290_v11  ;;  %v292_v18 = vld [vmem:[%s1218_s1 + $0x10] sm:$0xff] }
  0x42   : > { %v227_v27 = vadd.f32 %v226_v20, %v225_v23  ;;  %841 = vmatprep.subr.bf16.mxu0 %v840_v15  ;;  %848 = vmatprep.subr.bf16.mxu1 %v840_v15  ;;  %v293_v20 = vld [vmem:[%s1218_s1 + $0x18] sm:$0xff] }
  0x43   : > { %843 = vmatpush3.bf16.msra.mxu0 %v840_v15  ;;  %850 = vmatpush3.bf16.msra.mxu1 %v840_v15  ;;  %v844_v23 = vpack.c.bf16 %v293_v20, %v292_v18 }
  0x44   : > { %v229_v32 = vadd.f32 %v228_v24, %v227_v27 }
  0x45   : > { %845 = vmatprep.subr.bf16.mxu0 %v844_v23  ;;  %849 = vmatprep.subr.bf16.mxu1 %v844_v23 }
  0x46   : > { %v231_v36 = vadd.f32 %v230_v29, %v229_v32 }
  0x47   : > { %847 = vmatpush3.bf16.msra.mxu0 %v844_v23  ;;  %851 = vmatpush3.bf16.msra.mxu1 %v844_v23 }
  0x48   : > { %v233_v41 = vadd.f32 %v232_v33, %v231_v36 }
  0x4a   : > { %v235_v44 = vadd.f32 %v234_v38, %v233_v41 }
  0x4c   : > { %v237_v47 = vadd.f32 %v236_v42, %v235_v44 }
  0x4e   : > { %v239_v48 = vadd.f32 %v238_v45, %v237_v47 }
  0x50   : > { %v240_v50 = vrot.slane %v239_v48, 4 }
  0x52   : > { %v241_v51 = vadd.f32 %v240_v50, %v239_v48 }
  0x54   : > { %v242_v53 = vrot.slane %v241_v51, 2 }
  0x56   : > { %v243_v54 = vadd.f32 %v242_v53, %v241_v51 }
  0x58   : > { %v244_v56 = vrot.slane %v243_v54, 1 }
  0x5a   : > { %v245_v57 = vadd.f32 %v244_v56, %v243_v54 }
  0x5c   : > { %v246_v59 = vmul.f32 0.00390625, %v245_v57 }
  0x5e   : > { %v247_v60 = vsel %vm176_vm0, %v246_v59, -inf }
  0x5f   : > { %248 = vmax.xlane.f32.xlu0 %v247_v60 }
  0xec   : > { %v249_v62 = vpop.xlane.xlu0 %248 }
  0xed   : > { %v250_v63 = vsub.f32 %v246_v59, %v249_v62 }
  0xef   : > { %v251_v5 = vmul.f32 1.442695, %v250_v63 }
  0xf1   : > { %860 = vpow2.f32 %v251_v5 }
  0xfb   : > { %v861_v6 = vpop.eup %860 }
  0xfc   : > { %v253_v9 = vsel %vm176_vm0, %v861_v6, 0.0 }
  0xfd   : > { %254 = vadd.xlane.f32.xlu0 %v253_v9 }
 0x18a   : > { %v255_v24 = vpop.xlane.xlu0 %254 }
 0x18b   : > { %862 = vrcp.f32 %v255_v24 }
 0x195   : > { %v863_v27 = vpop.eup %862 }
 0x196   : > { %v257_v29 = vmul.f32 %v863_v27, %v861_v6 }
 0x198   : > { %v258_v32 = vmul.f32 %v257_v29, %v906_v0  ;;  %v274_v33 = vmul.f32 %v257_v29, %v984_v43  ;;  %v259_v36 = vmul.f32 %v257_v29, %v909_v1  ;;  %v275_v38 = vmul.f32 %v257_v29, %v989_v46 }
 0x199   : > { %v260_v41 = vmul.f32 %v257_v29, %v912_v2  ;;  %v276_v42 = vmul.f32 %v257_v29, %v994_v49  ;;  %v261_v0 = vmul.f32 %v257_v29, %v915_v3  ;;  %v277_v1 = vmul.f32 %v257_v29, %v999_v52 }
 0x19a   : > { %792 = vmatprep.mubr.msk.f32.mxu0 %vm176_vm0, %v258_v32  ;;  %816 = vmatprep.mubr.msk.f32.mxu1 %vm176_vm0, %v274_v33  ;;  %v262_v43 = vmul.f32 %v257_v29, %v924_v7  ;;  %v278_v46 = vmul.f32 %v257_v29, %v1004_v55  ;;  %v263_v2 = vmul.f32 %v257_v29, %v929_v10 }
 0x19b   : > { %793 = vmatmul.mubr.msk.f32.vlgmr.msra.gmra.mrb[0].mxu0 %vm176_vm0, %v259_v36  ;;  %817 = vmatmul.mubr.msk.f32.vlgmr.msra.gmra.mrb[0].mxu1 %vm176_vm0, %v275_v38  ;;  %v279_v49 = vmul.f32 %v257_v29, %v1009_v58  ;;  %v264_v3 = vmul.f32 %v257_v29, %v934_v13  ;;  %v280_v52 = vmul.f32 %v257_v29, %v1014_v61 }
 0x19c   : > { %795 = vmatprep.mubr.msk.f32.mxu0 %vm176_vm0, %v260_v41  ;;  %819 = vmatprep.mubr.msk.f32.mxu1 %vm176_vm0, %v276_v42  ;;  %v265_v7 = vmul.f32 %v257_v29, %v939_v16  ;;  %v281_v55 = vmul.f32 %v257_v29, %v1019_v4  ;;  %v266_v10 = vmul.f32 %v257_v29, %v944_v19 }
 0x19d   : > { %v282_v58 = vmul.f32 %v257_v29, %v1024_v8  ;;  %v267_v13 = vmul.f32 %v257_v29, %v949_v22  ;;  %v283_v61 = vmul.f32 %v257_v29, %v1029_v12  ;;  %v268_v16 = vmul.f32 %v257_v29, %v954_v25 }
 0x19e   : > { %v284_v4 = vmul.f32 %v257_v29, %v1034_v17  ;;  %v269_v19 = vmul.f32 %v257_v29, %v959_v28  ;;  %v285_v8 = vmul.f32 %v257_v29, %v1039_v21  ;;  %v270_v22 = vmul.f32 %v257_v29, %v964_v31 }
 0x19f   : > { %796 = vmatmul.mubr.msk.f32.gmra.mrb[2].mxu0 %vm176_vm0, %v261_v0  ;;  %820 = vmatmul.mubr.msk.f32.gmra.mrb[2].mxu1 %vm176_vm0, %v277_v1  ;;  %v286_v12 = vmul.f32 %v257_v29, %v1044_v26  ;;  %v271_v25 = vmul.f32 %v257_v29, %v969_v34  ;;  %v287_v17 = vmul.f32 %v257_v29, %v1049_v30 }
 0x1a0   : > { %798 = vmatprep.mubr.msk.f32.mxu0 %vm176_vm0, %v262_v43  ;;  %822 = vmatprep.mubr.msk.f32.mxu1 %vm176_vm0, %v278_v46  ;;  %v272_v28 = vmul.f32 %v257_v29, %v974_v37  ;;  %v288_v21 = vmul.f32 %v257_v29, %v1054_v35  ;;  %v273_v31 = vmul.f32 %v257_v29, %v979_v40 }
 0x1a1   : > { %v289_v26 = vmul.f32 %v257_v29, %v1059_v39 }
 0x1a3   : > { %799 = vmatmul.mubr.msk.f32.gmra.mrb[4].mxu0 %vm176_vm0, %v263_v2  ;;  %823 = vmatmul.mubr.msk.f32.gmra.mrb[4].mxu1 %vm176_vm0, %v279_v49 }
 0x1a4   : > { %801 = vmatprep.mubr.msk.f32.mxu0 %vm176_vm0, %v264_v3  ;;  %825 = vmatprep.mubr.msk.f32.mxu1 %vm176_vm0, %v280_v52 }
 0x1a7   : > { %802 = vmatmul.mubr.msk.f32.gmra.mrb[6].mxu0 %vm176_vm0, %v265_v7  ;;  %826 = vmatmul.mubr.msk.f32.gmra.mrb[6].mxu1 %vm176_vm0, %v281_v55 }
 0x1a8   : > { %804 = vmatprep.mubr.msk.f32.mxu0 %vm176_vm0, %v266_v10  ;;  %828 = vmatprep.mubr.msk.f32.mxu1 %vm176_vm0, %v282_v58 }
 0x1ab   : > { %805 = vmatmul.mubr.msk.f32.gmra.mrb[8].mxu0 %vm176_vm0, %v267_v13  ;;  %829 = vmatmul.mubr.msk.f32.gmra.mrb[8].mxu1 %vm176_vm0, %v283_v61 }
 0x1ac   : > { %807 = vmatprep.mubr.msk.f32.mxu0 %vm176_vm0, %v268_v16  ;;  %831 = vmatprep.mubr.msk.f32.mxu1 %vm176_vm0, %v284_v4 }
 0x1af   : > { %808 = vmatmul.mubr.msk.f32.gmra.mrb[10].mxu0 %vm176_vm0, %v269_v19  ;;  %832 = vmatmul.mubr.msk.f32.gmra.mrb[10].mxu1 %vm176_vm0, %v285_v8 }
 0x1b0   : > { %810 = vmatprep.mubr.msk.f32.mxu0 %vm176_vm0, %v270_v22  ;;  %834 = vmatprep.mubr.msk.f32.mxu1 %vm176_vm0, %v286_v12 }
 0x1b3   : > { %811 = vmatmul.mubr.msk.f32.gmra.mrb[12].mxu0 %vm176_vm0, %v271_v25  ;;  %835 = vmatmul.mubr.msk.f32.gmra.mrb[12].mxu1 %vm176_vm0, %v287_v17 }
 0x1b4   : > { %813 = vmatprep.mubr.msk.f32.mxu0 %vm176_vm0, %v272_v28  ;;  %837 = vmatprep.mubr.msk.f32.mxu1 %vm176_vm0, %v288_v21 }
 0x1b7   : > { %814 = vmatmul.mubr.msk.f32.gmra.mrb[14].mxu0 %vm176_vm0, %v273_v31  ;;  %838 = vmatmul.mubr.msk.f32.gmra.mrb[14].mxu1 %vm176_vm0, %v289_v26 }
 0x26e   : > { %v794_v34 = vpop.f32.mrb[0].mxu0  ;;  %v818_v37 = vpop.f32.mrb[0].mxu1 }
 0x26f   : > { %617 = vst.msk [vmem:[%s1148_s25 + $0x8] sm:$0xff] %vm615_vm1, %v794_v34  ;;  %633 = vst.msk [vmem:[%s1148_s25 + $0x88] sm:$0xff] %vm615_vm1, %v818_v37  ;;  %v456_v40 = vpop.f32.mrb[1].mxu0  ;;  %v536_v30 = vpop.f32.mrb[1].mxu1 }
 0x270   : > { %616 = vst.msk [vmem:[%s1148_s25] sm:$0xff] %vm615_vm1, %v456_v40  ;;  %632 = vst.msk [vmem:[%s1148_s25 + $0x80] sm:$0xff] %vm615_vm1, %v536_v30 }
 0x272   : > { %v797_v35 = vpop.f32.mrb[2].mxu0  ;;  %v821_v39 = vpop.f32.mrb[2].mxu1 }
 0x273   : > { %619 = vst.msk [vmem:[%s1148_s25 + $0x18] sm:$0xff] %vm615_vm1, %v797_v35  ;;  %635 = vst.msk [vmem:[%s1148_s25 + $0x98] sm:$0xff] %vm615_vm1, %v821_v39  ;;  %v466_v44 = vpop.f32.mrb[3].mxu0  ;;  %v546_v45 = vpop.f32.mrb[3].mxu1 }
 0x274   : > { %618 = vst.msk [vmem:[%s1148_s25 + $0x10] sm:$0xff] %vm615_vm1, %v466_v44  ;;  %634 = vst.msk [vmem:[%s1148_s25 + $0x90] sm:$0xff] %vm615_vm1, %v546_v45 }
 0x276   : > { %v800_v47 = vpop.f32.mrb[4].mxu0  ;;  %v824_v48 = vpop.f32.mrb[4].mxu1 }
 0x277   : > { %621 = vst.msk [vmem:[%s1148_s25 + $0x28] sm:$0xff] %vm615_vm1, %v800_v47  ;;  %637 = vst.msk [vmem:[%s1148_s25 + $0xa8] sm:$0xff] %vm615_vm1, %v824_v48  ;;  %v476_v50 = vpop.f32.mrb[5].mxu0  ;;  %v556_v51 = vpop.f32.mrb[5].mxu1 }
 0x278   : > { %620 = vst.msk [vmem:[%s1148_s25 + $0x20] sm:$0xff] %vm615_vm1, %v476_v50  ;;  %636 = vst.msk [vmem:[%s1148_s25 + $0xa0] sm:$0xff] %vm615_vm1, %v556_v51 }
 0x27a   : > { %v803_v53 = vpop.f32.mrb[6].mxu0  ;;  %v827_v54 = vpop.f32.mrb[6].mxu1 }
 0x27b   : > { %623 = vst.msk [vmem:[%s1148_s25 + $0x38] sm:$0xff] %vm615_vm1, %v803_v53  ;;  %639 = vst.msk [vmem:[%s1148_s25 + $0xb8] sm:$0xff] %vm615_vm1, %v827_v54  ;;  %v486_v56 = vpop.f32.mrb[7].mxu0  ;;  %v566_v57 = vpop.f32.mrb[7].mxu1 }
 0x27c   : > { %622 = vst.msk [vmem:[%s1148_s25 + $0x30] sm:$0xff] %vm615_vm1, %v486_v56  ;;  %638 = vst.msk [vmem:[%s1148_s25 + $0xb0] sm:$0xff] %vm615_vm1, %v566_v57 }
 0x27e   : > { %v806_v59 = vpop.f32.mrb[8].mxu0  ;;  %v830_v60 = vpop.f32.mrb[8].mxu1 }
 0x27f   : > { %625 = vst.msk [vmem:[%s1148_s25 + $0x48] sm:$0xff] %vm615_vm1, %v806_v59  ;;  %641 = vst.msk [vmem:[%s1148_s25 + $0xc8] sm:$0xff] %vm615_vm1, %v830_v60  ;;  %v496_v62 = vpop.f32.mrb[9].mxu0  ;;  %v576_v63 = vpop.f32.mrb[9].mxu1 }
 0x280   : > { %624 = vst.msk [vmem:[%s1148_s25 + $0x40] sm:$0xff] %vm615_vm1, %v496_v62  ;;  %640 = vst.msk [vmem:[%s1148_s25 + $0xc0] sm:$0xff] %vm615_vm1, %v576_v63 }
 0x282   : > { %v809_v5 = vpop.f32.mrb[10].mxu0  ;;  %v833_v6 = vpop.f32.mrb[10].mxu1 }
 0x283   : > { %627 = vst.msk [vmem:[%s1148_s25 + $0x58] sm:$0xff] %vm615_vm1, %v809_v5  ;;  %643 = vst.msk [vmem:[%s1148_s25 + $0xd8] sm:$0xff] %vm615_vm1, %v833_v6  ;;  %v506_v9 = vpop.f32.mrb[11].mxu0  ;;  %v586_v11 = vpop.f32.mrb[11].mxu1 }
 0x284   : > { %626 = vst.msk [vmem:[%s1148_s25 + $0x50] sm:$0xff] %vm615_vm1, %v506_v9  ;;  %642 = vst.msk [vmem:[%s1148_s25 + $0xd0] sm:$0xff] %vm615_vm1, %v586_v11 }
 0x286   : > { %v812_v14 = vpop.f32.mrb[12].mxu0  ;;  %v836_v15 = vpop.f32.mrb[12].mxu1 }
 0x287   : > { %629 = vst.msk [vmem:[%s1148_s25 + $0x68] sm:$0xff] %vm615_vm1, %v812_v14  ;;  %645 = vst.msk [vmem:[%s1148_s25 + $0xe8] sm:$0xff] %vm615_vm1, %v836_v15  ;;  %v516_v18 = vpop.f32.mrb[13].mxu0  ;;  %v596_v20 = vpop.f32.mrb[13].mxu1 }
 0x288   : > { %628 = vst.msk [vmem:[%s1148_s25 + $0x60] sm:$0xff] %vm615_vm1, %v516_v18  ;;  %644 = vst.msk [vmem:[%s1148_s25 + $0xe0] sm:$0xff] %vm615_vm1, %v596_v20 }
 0x28a   : > { %v815_v23 = vpop.f32.mrb[14].mxu0  ;;  %v839_v24 = vpop.f32.mrb[14].mxu1 }
 0x28b   : > { %631 = vst.msk [vmem:[%s1148_s25 + $0x78] sm:$0xff] %vm615_vm1, %v815_v23  ;;  %647 = vst.msk [vmem:[%s1148_s25 + $0xf8] sm:$0xff] %vm615_vm1, %v839_v24  ;;  %v526_v27 = vpop.f32.mrb[15].mxu0  ;;  %v606_v29 = vpop.f32.mrb[15].mxu1 }
 0x28c   : > { %630 = vst.msk [vmem:[%s1148_s25 + $0x70] sm:$0xff] %vm615_vm1, %v526_v27  ;;  %646 = vst.msk [vmem:[%s1148_s25 + $0xf0] sm:$0xff] %vm615_vm1, %v606_v29 }
 0x28d PF: > { %s12_s9 = sadd.s32 1, %s870_s9  }
 0x28e   : > { %p9_p4 = scmp.ge.s32.totalorder %s12_s9, 4  }
 0x290   :  { %11 = sbr.rel (!%p9_p4) target bundleno = 1 (0x1), region = 58 }

</bundles_post_ra>
